<compile_context>
chip_gen: v7x
topology: tpu7x:2x2x1
jax: 0.10.0
libtpu: 0.0.40
codegen_flags: <defaults>
</compile_context>

<pallas_src>
import math
import numpy as np
import jax
import jax.numpy as jnp
from jax.experimental import pallas as pl
from jax.experimental.pallas import tpu as pltpu

LS = (4, 6)                 # angular momentum numbers
HEAD_NEURONS = (64, 4)      # e3nn FullyConnectedNet([2*len(LS)] + head_neurons, silu)


# ----------------------------------------------------------------------------
# Host-side deterministic constants (Legendre / Wigner-3j / activation norm).
# ----------------------------------------------------------------------------
def _pi_lm_coeffs(l, m):
    """Coefficients (ascending) of d^m/dz^m P_l(z)."""
    c = np.zeros(l + 1)
    c[l] = 1.0
    p = np.polynomial.legendre.leg2poly(c)
    d = np.polynomial.polynomial.polyder(p, m) if m > 0 else p
    return [float(v) for v in d]


def _n_lm(l, m):
    return math.sqrt((2 * l + 1) / (4 * math.pi)
                     * math.factorial(l - m) / math.factorial(l + m))


def _wigner_3j(j1, j2, j3, m1, m2, m3):
    if m1 + m2 + m3 != 0:
        return 0.0
    f = math.factorial
    t1 = f(j1 + j2 - j3) * f(j1 - j2 + j3) * f(-j1 + j2 + j3) / f(j1 + j2 + j3 + 1)
    t2 = (f(j1 + m1) * f(j1 - m1) * f(j2 + m2) * f(j2 - m2)
          * f(j3 + m3) * f(j3 - m3))
    kmin = max(0, j2 - j3 - m1, j1 - j3 + m2)
    kmax = min(j1 + j2 - j3, j1 - m1, j2 + m2)
    s = 0.0
    for k in range(kmin, kmax + 1):
        s += (-1.0) ** k / (f(k) * f(j1 + j2 - j3 - k) * f(j1 - m1 - k)
                            * f(j2 + m2 - k) * f(j3 - j2 + m1 + k)
                            * f(j3 - j1 - m2 + k))
    return (-1.0) ** (j1 - j2 - m3) * math.sqrt(t1 * t2) * s


def _real_wigner_3j(l):
    """wigner_3j(l,l,l) expressed in the real-SH basis used by the kernel."""
    dim = 2 * l + 1
    W = np.zeros((dim, dim, dim), dtype=np.complex128)
    for m1 in range(-l, l + 1):
        for m2 in range(-l, l + 1):
            m3 = -m1 - m2
            if abs(m3) <= l:
                W[m1 + l, m2 + l, m3 + l] = _wigner_3j(l, l, l, m1, m2, m3)
    # complex q^m = sum_a U[m+l, a+l] * real q_a   (real index a: -l..l)
    U = np.zeros((dim, dim), dtype=np.complex128)
    U[l, l] = 1.0
    for m in range(1, l + 1):
        s = (-1.0) ** m / math.sqrt(2.0)
        U[l + m, l + m] = s
        U[l + m, l - m] = 1j * s
        U[l - m, l + m] = 1.0 / math.sqrt(2.0)
        U[l - m, l - m] = -1j / math.sqrt(2.0)
    C = np.einsum('ijk,ia,jb,kc->abc', W, U, U, U)
    assert np.abs(C.imag).max() < 1e-9
    return np.ascontiguousarray(C.real).astype(np.float32)


def _silu_2mom_cst():
    """e3nn normalize2mom constant for silu: 1/sqrt(E_{z~N(0,1)}[silu(z)^2])."""
    z = np.linspace(-12.0, 12.0, 48001)
    dz = z[1] - z[0]
    pdf = np.exp(-0.5 * z * z) / math.sqrt(2.0 * math.pi)
    silu = z / (1.0 + np.exp(-z))
    return float(1.0 / math.sqrt(np.sum(silu * silu * pdf) * dz))


C_REAL = {l: _real_wigner_3j(l) for l in LS}
ACT_CST = _silu_2mom_cst()


def _horner(z, coeffs):
    r = jnp.full_like(z, coeffs[-1])
    for c in reversed(coeffs[:-1]):
        r = r * z + c
    return r


# ----------------------------------------------------------------------------
# Fused kernel: SH on the edge tile -> in-register one-hot scatter matmul ->
# accumulate over the edge (reduction) grid axis -> q/w + MLP head on the last
# edge step.  All tensors are lane-dense (edges / nodes on the lane axis).
# ----------------------------------------------------------------------------
def _make_fused_kernel(ls, node_tile, edge_tile, act_cst):
    pi_coeffs = {(l, m): _pi_lm_coeffs(l, m) for l in ls for m in range(l + 1)}
    n_lm = {(l, m): _n_lm(l, m) for l in ls for m in range(l + 1)}
    lmax = max(ls)
    dims = [2 * l + 1 for l in ls]
    n_sh = sum(dims)                       # 22 SH rows; row n_sh is the count row

    def kernel(dst_ref, ev_ref, c4_ref, c6_ref, w1t_ref, w2t_ref,
               out_ref, emb_ref, acc_ref):
        j = pl.program_id(1)

        @pl.when(j == 0)
        def _init():
            acc_ref[...] = jnp.zeros_like(acc_ref)

        # ---- spherical harmonics for this edge tile, lane-dense (1, te) rows ----
        v = ev_ref[...]                                    # (3, te)
        x, y, z = v[0:1, :], v[1:2, :], v[2:3, :]
        r2 = x * x + y * y + z * z
        inv_r = jnp.where(r2 > 0.0, jax.lax.rsqrt(jnp.maximum(r2, 1e-30)), 0.0)
        x, y, z = x * inv_r, y * inv_r, z * inv_r
        # A_m = Re((x+iy)^m) = sin^m(theta) cos(m phi), B_m = Im((x+iy)^m)
        A = [jnp.ones_like(x)]
        B = [jnp.zeros_like(x)]
        for m in range(1, lmax + 1):
            A.append(A[m - 1] * x - B[m - 1] * y)
            B.append(A[m - 1] * y + B[m - 1] * x)
        rows = []
        for l in ls:
            rl = [None] * (2 * l + 1)                      # row a <-> m = a - l
            rl[l] = n_lm[(l, 0)] * _horner(z, pi_coeffs[(l, 0)])
            for m in range(1, l + 1):
                c = math.sqrt(2.0) * n_lm[(l, m)]
                pim = _horner(z, pi_coeffs[(l, m)])
                rl[l + m] = c * pim * A[m]
                rl[l - m] = c * pim * B[m]
            rows.extend(rl)
        rows.append(jnp.ones_like(x))                      # edge-count row
        y_t = jnp.concatenate(rows, axis=0)                # (n_sh + 1, te)

        # ---- one-hot scatter tile, built in-register (edges x nodes) ----
        node_base = pl.program_id(0) * node_tile
        node_ids = node_base + jax.lax.broadcasted_iota(
            jnp.int32, (edge_tile, node_tile), 1)
        scat_t = (dst_ref[...] == node_ids).astype(jnp.float32)   # (te, tn)

        # ---- accumulate scatter-sum: one wide MXU pass per grid step ----
        acc_ref[...] += jnp.dot(y_t, scat_t, preferred_element_type=jnp.float32)

        # ---- finalize q_l / w_l and MLP head on the last edge tile ----
        @pl.when(j == pl.num_programs(1) - 1)
        def _fin():
            acc = acc_ref[...]                             # (n_sh + 1, tn)
            cnt = acc[n_sh:n_sh + 1, :]
            inv_cnt = 1.0 / jnp.maximum(cnt, 1.0)          # scatter reduce='mean'

            def q_w(Q, c2):                                # Q: (dim, tn)
                dim = Q.shape[0]
                norm = jnp.sum(Q * Q, axis=0, keepdims=True)
                q_l = jnp.sqrt(norm * (4.0 * math.pi / dim))
                # qq[b*dim + c, n] = Q[b, n] * Q[c, n]
                qq = jnp.concatenate([Q * Q[b:b + 1, :] for b in range(dim)],
                                     axis=0)               # (dim*dim, tn)
                t = jnp.dot(c2, qq, preferred_element_type=jnp.float32)  # (dim, tn)
                w_raw = jnp.sum(Q * t, axis=0, keepdims=True)
                inv = jax.lax.rsqrt(jnp.maximum(norm, 1e-20))
                w_l = jnp.where(norm > 0.0, w_raw * (inv * inv * inv), 0.0)
                return q_l, w_l

            q4, w4 = q_w(acc[0:dims[0], :] * inv_cnt, c4_ref[...])
            q6, w6 = q_w(acc[dims[0]:n_sh, :] * inv_cnt, c6_ref[...])
            emb_t = jnp.concatenate([q4, q6, w4, w6], axis=0)     # (4, tn)

            # e3nn FullyConnectedNet([4, 64, 4], silu), transposed:
            #   h = act(W1^T @ emb / sqrt(4)),  out = W2^T @ h / sqrt(64)
            h = jnp.dot(w1t_ref[...], emb_t,
                        preferred_element_type=jnp.float32)
            h = h * (1.0 / math.sqrt(emb_t.shape[0]))
            h = act_cst * h * jax.nn.sigmoid(h)
            o = jnp.dot(w2t_ref[...], h,
                        preferred_element_type=jnp.float32)
            out_ref[...] = o * (1.0 / math.sqrt(h.shape[0]))
            emb_ref[...] = emb_t

    return kernel


# ----------------------------------------------------------------------------
# Wrapper: padding to tile multiples, transposed lane-dense operands, pallas_call.
# ----------------------------------------------------------------------------
def steinhardt_net_forward(x, edge_index, edge_attr, w1, w2,
                           node_tile=128, edge_tile=512):
    num_nodes = int(x.shape[0])
    num_edges = int(edge_attr.shape[0])
    n_sh = sum(2 * l + 1 for l in LS)

    def rup(a, b):
        return ((a + b - 1) // b) * b

    # Tile sizes: multiples of 128 (lane width); clamp for tiny graphs.
    node_tile = min(node_tile, rup(max(num_nodes, 1), 128))
    edge_tile = min(edge_tile, rup(max(num_edges, 1), 128))
    n_pad = rup(max(num_nodes, 1), node_tile)
    e_pad = rup(max(num_edges, 1), edge_tile)
    n_node_tiles = n_pad // node_tile
    n_edge_tiles = e_pad // edge_tile

    # Padded / transposed operands.  Padded edges get dst = -1 (never scatter)
    # and a zero edge vector (SH guarded against r = 0).
    dst = edge_index[1].astype(jnp.int32)
    dst2d = jnp.full((e_pad, 1), -1, dtype=jnp.int32).at[:num_edges, 0].set(dst)
    ev_t = jnp.zeros((3, e_pad), jnp.float32).at[:, :num_edges].set(
        edge_attr.astype(jnp.float32).T)

    c4 = jnp.asarray(C_REAL[LS[0]].reshape(2 * LS[0] + 1, -1))   # (9, 81)
    c6 = jnp.asarray(C_REAL[LS[1]].reshape(2 * LS[1] + 1, -1))   # (13, 169)
    w1t = w1.astype(jnp.float32).T                               # (64, 4)
    w2t = w2.astype(jnp.float32).T                               # (4, 64)

    kernel = _make_fused_kernel(LS, node_tile, edge_tile, ACT_CST)

    def full_spec(shape):
        return pl.BlockSpec(shape, lambda i, j: (0, 0))

    out_t, emb_t = pl.pallas_call(
        kernel,
        out_shape=(jax.ShapeDtypeStruct((HEAD_NEURONS[-1], n_pad), jnp.float32),
                   jax.ShapeDtypeStruct((2 * len(LS), n_pad), jnp.float32)),
        grid=(n_node_tiles, n_edge_tiles),
        in_specs=[
            pl.BlockSpec((edge_tile, 1), lambda i, j: (j, 0)),    # dst ids
            pl.BlockSpec((3, edge_tile), lambda i, j: (0, j)),    # edge vectors^T
            full_spec(c4.shape),
            full_spec(c6.shape),
            full_spec(w1t.shape),
            full_spec(w2t.shape),
        ],
        out_specs=(pl.BlockSpec((HEAD_NEURONS[-1], node_tile), lambda i, j: (0, i)),
                   pl.BlockSpec((2 * len(LS), node_tile), lambda i, j: (0, i))),
        scratch_shapes=[pltpu.VMEM((n_sh + 1, node_tile), jnp.float32)],
        compiler_params=pltpu.CompilerParams(
            dimension_semantics=("parallel", "arbitrary")),
    )(dst2d, ev_t, c4, c6, w1t, w2t)

    # Outputs are produced lane-dense (features x nodes); transpose + strip padding.
    out = out_t.T[:num_nodes]
    emb = emb_t.T[:num_nodes]
    return out, emb                                        # eval mode: (head(emb), emb)


if __name__ == "__main__":
    key = jax.random.PRNGKey(0)
    k_vec, k_src, k_dst, k_w1, k_w2 = jax.random.split(key, 5)
    num_nodes, num_edges = 16, 64

    edge_attr = jax.random.normal(k_vec, (num_edges, 3), dtype=jnp.float32)
    edge_index = jnp.stack([
        jax.random.randint(k_src, (num_edges,), 0, num_nodes),
        jax.random.randint(k_dst, (num_edges,), 0, num_nodes),
    ])
    x = jnp.zeros((num_nodes, 1), dtype=jnp.float32)       # data.x only supplies len(x)

    # e3nn FullyConnectedNet weights are plain randn(h_in, h_out); deterministic init.
    w1 = jax.random.normal(k_w1, (2 * len(LS), HEAD_NEURONS[0]), dtype=jnp.float32)
    w2 = jax.random.normal(k_w2, (HEAD_NEURONS[0], HEAD_NEURONS[1]), dtype=jnp.float32)

    out, emb = jax.jit(steinhardt_net_forward)(x, edge_index, edge_attr, w1, w2)
    jax.block_until_ready(out)
    jax.block_until_ready(emb)

    assert out.shape == (num_nodes, HEAD_NEURONS[-1])
    assert emb.shape == (num_nodes, 2 * len(LS))
    assert np.all(np.isfinite(np.asarray(out))) and np.all(np.isfinite(np.asarray(emb)))
    print("KERNEL_OK")
</pallas_src>

<mosaic_0001>
module attributes {stable_mosaic.version = 11 : i64} {
  func.func @kernel(%arg0: i32, %arg1: i32, %arg2: memref<128x1xi32, #tpu.memory_space<vmem>>, %arg3: memref<3x128xf32, #tpu.memory_space<vmem>>, %arg4: memref<9x81xf32, #tpu.memory_space<vmem>>, %arg5: memref<13x169xf32, #tpu.memory_space<vmem>>, %arg6: memref<64x4xf32, #tpu.memory_space<vmem>>, %arg7: memref<4x64xf32, #tpu.memory_space<vmem>>, %arg8: memref<4x128xf32, #tpu.memory_space<vmem>>, %arg9: memref<4x128xf32, #tpu.memory_space<vmem>>, %arg10: memref<23x128xf32, #tpu.memory_space<vmem>>) attributes {dimension_semantics = [#tpu.dimension_semantics<parallel>, #tpu.dimension_semantics<arbitrary>], iteration_bounds = array<i64: 1, 1>, scalar_prefetch = 0 : i64, scratch_operands = 1 : i64, tpu.core_type = #tpu.core_type<tc>, window_params = [{transform_indices = @transform_0, window_bounds = array<i64: 128, 1>}, {transform_indices = @transform_1, window_bounds = array<i64: 3, 128>}, {pipeline_mode = #tpu.pipeline_mode<synchronous>, transform_indices = @transform_2, window_bounds = array<i64: 9, 81>}, {pipeline_mode = #tpu.pipeline_mode<synchronous>, transform_indices = @transform_3, window_bounds = array<i64: 13, 169>}, {pipeline_mode = #tpu.pipeline_mode<synchronous>, transform_indices = @transform_4, window_bounds = array<i64: 64, 4>}, {pipeline_mode = #tpu.pipeline_mode<synchronous>, transform_indices = @transform_5, window_bounds = array<i64: 4, 64>}, {transform_indices = @transform_6, window_bounds = array<i64: 4, 128>}, {transform_indices = @transform_7, window_bounds = array<i64: 4, 128>}]} {
    %c0_i32 = arith.constant 0 : i32
    %0 = arith.cmpi eq, %arg1, %c0_i32 : i32
    %1 = arith.extui %0 : i1 to i32
    %c0_i32_0 = arith.constant 0 : i32
    %2 = arith.cmpi ne, %1, %c0_i32_0 : i32
    scf.if %2 {
      %cst_81 = arith.constant 0.000000e+00 : f32
      %249 = vector.broadcast %cst_81 : f32 to vector<23x128xf32>
      %c0_82 = arith.constant 0 : index
      %c0_83 = arith.constant 0 : index
      %250 = vector.load %arg10[%c0_82, %c0_83] : memref<23x128xf32, #tpu.memory_space<vmem>>, vector<23x128xf32>
      tpu.vector_store %arg10[%c0_82, %c0_83], %249 {strides = array<i32>} : memref<23x128xf32, #tpu.memory_space<vmem>>, vector<23x128xf32>,
    } else {
    }
    %c0 = arith.constant 0 : index
    %c0_1 = arith.constant 0 : index
    %3 = vector.load %arg3[%c0, %c0_1] : memref<3x128xf32, #tpu.memory_space<vmem>>, vector<3x128xf32>
    %4 = vector.extract_strided_slice %3 {offsets = [0, 0], sizes = [1, 128], strides = [1, 1]} : vector<3x128xf32> to vector<1x128xf32>
    %5 = vector.extract_strided_slice %3 {offsets = [1, 0], sizes = [1, 128], strides = [1, 1]} : vector<3x128xf32> to vector<1x128xf32>
    %6 = vector.extract_strided_slice %3 {offsets = [2, 0], sizes = [1, 128], strides = [1, 1]} : vector<3x128xf32> to vector<1x128xf32>
    %7 = arith.mulf %4, %4 : vector<1x128xf32>
    %8 = arith.mulf %5, %5 : vector<1x128xf32>
    %9 = arith.addf %7, %8 : vector<1x128xf32>
    %10 = arith.mulf %6, %6 : vector<1x128xf32>
    %11 = arith.addf %9, %10 : vector<1x128xf32>
    %cst = arith.constant 0.000000e+00 : f32
    %12 = vector.broadcast %cst : f32 to vector<1x128xf32>
    %13 = arith.cmpf ogt, %11, %12 : vector<1x128xf32>
    %cst_2 = arith.constant 1.000000e-30 : f32
    %14 = vector.broadcast %cst_2 : f32 to vector<1x128xf32>
    %15 = arith.maximumf %11, %14 : vector<1x128xf32>
    %16 = math.rsqrt %15 : vector<1x128xf32>
    %cst_3 = arith.constant 0.000000e+00 : f32
    %17 = vector.broadcast %cst_3 : f32 to vector<1x128xf32>
    %18 = arith.select %13, %16, %17 : vector<1x128xi1>, vector<1x128xf32>
    %19 = arith.mulf %4, %18 : vector<1x128xf32>
    %20 = arith.mulf %5, %18 : vector<1x128xf32>
    %21 = arith.mulf %6, %18 : vector<1x128xf32>
    %cst_4 = arith.constant 1.000000e+00 : f32
    %22 = vector.broadcast %cst_4 : f32 to vector<1x128xf32>
    %cst_5 = arith.constant 0.000000e+00 : f32
    %23 = vector.broadcast %cst_5 : f32 to vector<1x128xf32>
    %24 = arith.mulf %22, %19 : vector<1x128xf32>
    %25 = arith.mulf %23, %20 : vector<1x128xf32>
    %26 = arith.subf %24, %25 : vector<1x128xf32>
    %27 = arith.mulf %22, %20 : vector<1x128xf32>
    %28 = arith.mulf %23, %19 : vector<1x128xf32>
    %29 = arith.addf %27, %28 : vector<1x128xf32>
    %30 = arith.mulf %26, %19 : vector<1x128xf32>
    %31 = arith.mulf %29, %20 : vector<1x128xf32>
    %32 = arith.subf %30, %31 : vector<1x128xf32>
    %33 = arith.mulf %26, %20 : vector<1x128xf32>
    %34 = arith.mulf %29, %19 : vector<1x128xf32>
    %35 = arith.addf %33, %34 : vector<1x128xf32>
    %36 = arith.mulf %32, %19 : vector<1x128xf32>
    %37 = arith.mulf %35, %20 : vector<1x128xf32>
    %38 = arith.subf %36, %37 : vector<1x128xf32>
    %39 = arith.mulf %32, %20 : vector<1x128xf32>
    %40 = arith.mulf %35, %19 : vector<1x128xf32>
    %41 = arith.addf %39, %40 : vector<1x128xf32>
    %42 = arith.mulf %38, %19 : vector<1x128xf32>
    %43 = arith.mulf %41, %20 : vector<1x128xf32>
    %44 = arith.subf %42, %43 : vector<1x128xf32>
    %45 = arith.mulf %38, %20 : vector<1x128xf32>
    %46 = arith.mulf %41, %19 : vector<1x128xf32>
    %47 = arith.addf %45, %46 : vector<1x128xf32>
    %48 = arith.mulf %44, %19 : vector<1x128xf32>
    %49 = arith.mulf %47, %20 : vector<1x128xf32>
    %50 = arith.subf %48, %49 : vector<1x128xf32>
    %51 = arith.mulf %44, %20 : vector<1x128xf32>
    %52 = arith.mulf %47, %19 : vector<1x128xf32>
    %53 = arith.addf %51, %52 : vector<1x128xf32>
    %54 = arith.mulf %50, %19 : vector<1x128xf32>
    %55 = arith.mulf %53, %20 : vector<1x128xf32>
    %56 = arith.subf %54, %55 : vector<1x128xf32>
    %57 = arith.mulf %50, %20 : vector<1x128xf32>
    %58 = arith.mulf %53, %19 : vector<1x128xf32>
    %59 = arith.addf %57, %58 : vector<1x128xf32>
    %cst_6 = arith.constant 4.375000e+00 : f32
    %60 = vector.broadcast %cst_6 : f32 to vector<1x128xf32>
    %61 = arith.mulf %60, %21 : vector<1x128xf32>
    %cst_7 = arith.constant 0.000000e+00 : f32
    %62 = vector.broadcast %cst_7 : f32 to vector<1x128xf32>
    %63 = arith.addf %61, %62 : vector<1x128xf32>
    %64 = arith.mulf %63, %21 : vector<1x128xf32>
    %cst_8 = arith.constant -3.750000e+00 : f32
    %65 = vector.broadcast %cst_8 : f32 to vector<1x128xf32>
    %66 = arith.addf %64, %65 : vector<1x128xf32>
    %67 = arith.mulf %66, %21 : vector<1x128xf32>
    %cst_9 = arith.constant 0.000000e+00 : f32
    %68 = vector.broadcast %cst_9 : f32 to vector<1x128xf32>
    %69 = arith.addf %67, %68 : vector<1x128xf32>
    %70 = arith.mulf %69, %21 : vector<1x128xf32>
    %cst_10 = arith.constant 3.750000e-01 : f32
    %71 = vector.broadcast %cst_10 : f32 to vector<1x128xf32>
    %72 = arith.addf %70, %71 : vector<1x128xf32>
    %cst_11 = arith.constant 0.846284389 : f32
    %73 = vector.broadcast %cst_11 : f32 to vector<1x128xf32>
    %74 = arith.mulf %73, %72 : vector<1x128xf32>
    %cst_12 = arith.constant 1.750000e+01 : f32
    %75 = vector.broadcast %cst_12 : f32 to vector<1x128xf32>
    %76 = arith.mulf %75, %21 : vector<1x128xf32>
    %cst_13 = arith.constant 0.000000e+00 : f32
    %77 = vector.broadcast %cst_13 : f32 to vector<1x128xf32>
    %78 = arith.addf %76, %77 : vector<1x128xf32>
    %79 = arith.mulf %78, %21 : vector<1x128xf32>
    %cst_14 = arith.constant -7.500000e+00 : f32
    %80 = vector.broadcast %cst_14 : f32 to vector<1x128xf32>
    %81 = arith.addf %79, %80 : vector<1x128xf32>
    %82 = arith.mulf %81, %21 : vector<1x128xf32>
    %cst_15 = arith.constant 0.000000e+00 : f32
    %83 = vector.broadcast %cst_15 : f32 to vector<1x128xf32>
    %84 = arith.addf %82, %83 : vector<1x128xf32>
    %cst_16 = arith.constant 0.267618626 : f32
    %85 = vector.broadcast %cst_16 : f32 to vector<1x128xf32>
    %86 = arith.mulf %85, %84 : vector<1x128xf32>
    %87 = arith.mulf %86, %26 : vector<1x128xf32>
    %cst_17 = arith.constant 0.267618626 : f32
    %88 = vector.broadcast %cst_17 : f32 to vector<1x128xf32>
    %89 = arith.mulf %88, %84 : vector<1x128xf32>
    %90 = arith.mulf %89, %29 : vector<1x128xf32>
    %cst_18 = arith.constant 5.250000e+01 : f32
    %91 = vector.broadcast %cst_18 : f32 to vector<1x128xf32>
    %92 = arith.mulf %91, %21 : vector<1x128xf32>
    %cst_19 = arith.constant 0.000000e+00 : f32
    %93 = vector.broadcast %cst_19 : f32 to vector<1x128xf32>
    %94 = arith.addf %92, %93 : vector<1x128xf32>
    %95 = arith.mulf %94, %21 : vector<1x128xf32>
    %cst_20 = arith.constant -7.500000e+00 : f32
    %96 = vector.broadcast %cst_20 : f32 to vector<1x128xf32>
    %97 = arith.addf %95, %96 : vector<1x128xf32>
    %cst_21 = arith.constant 0.063078314 : f32
    %98 = vector.broadcast %cst_21 : f32 to vector<1x128xf32>
    %99 = arith.mulf %98, %97 : vector<1x128xf32>
    %100 = arith.mulf %99, %32 : vector<1x128xf32>
    %cst_22 = arith.constant 0.063078314 : f32
    %101 = vector.broadcast %cst_22 : f32 to vector<1x128xf32>
    %102 = arith.mulf %101, %97 : vector<1x128xf32>
    %103 = arith.mulf %102, %35 : vector<1x128xf32>
    %cst_23 = arith.constant 1.050000e+02 : f32
    %104 = vector.broadcast %cst_23 : f32 to vector<1x128xf32>
    %105 = arith.mulf %104, %21 : vector<1x128xf32>
    %cst_24 = arith.constant 0.000000e+00 : f32
    %106 = vector.broadcast %cst_24 : f32 to vector<1x128xf32>
    %107 = arith.addf %105, %106 : vector<1x128xf32>
    %cst_25 = arith.constant 0.0168583877 : f32
    %108 = vector.broadcast %cst_25 : f32 to vector<1x128xf32>
    %109 = arith.mulf %108, %107 : vector<1x128xf32>
    %110 = arith.mulf %109, %38 : vector<1x128xf32>
    %cst_26 = arith.constant 0.0168583877 : f32
    %111 = vector.broadcast %cst_26 : f32 to vector<1x128xf32>
    %112 = arith.mulf %111, %107 : vector<1x128xf32>
    %113 = arith.mulf %112, %41 : vector<1x128xf32>
    %cst_27 = arith.constant 1.050000e+02 : f32
    %114 = vector.broadcast %cst_27 : f32 to vector<1x128xf32>
    %cst_28 = arith.constant 5.960340e-03 : f32
    %115 = vector.broadcast %cst_28 : f32 to vector<1x128xf32>
    %116 = arith.mulf %115, %114 : vector<1x128xf32>
    %117 = arith.mulf %116, %44 : vector<1x128xf32>
    %cst_29 = arith.constant 5.960340e-03 : f32
    %118 = vector.broadcast %cst_29 : f32 to vector<1x128xf32>
    %119 = arith.mulf %118, %114 : vector<1x128xf32>
    %120 = arith.mulf %119, %47 : vector<1x128xf32>
    %cst_30 = arith.constant 1.443750e+01 : f32
    %121 = vector.broadcast %cst_30 : f32 to vector<1x128xf32>
    %122 = arith.mulf %121, %21 : vector<1x128xf32>
    %cst_31 = arith.constant 0.000000e+00 : f32
    %123 = vector.broadcast %cst_31 : f32 to vector<1x128xf32>
    %124 = arith.addf %122, %123 : vector<1x128xf32>
    %125 = arith.mulf %124, %21 : vector<1x128xf32>
    %cst_32 = arith.constant -1.968750e+01 : f32
    %126 = vector.broadcast %cst_32 : f32 to vector<1x128xf32>
    %127 = arith.addf %125, %126 : vector<1x128xf32>
    %128 = arith.mulf %127, %21 : vector<1x128xf32>
    %cst_33 = arith.constant 0.000000e+00 : f32
    %129 = vector.broadcast %cst_33 : f32 to vector<1x128xf32>
    %130 = arith.addf %128, %129 : vector<1x128xf32>
    %131 = arith.mulf %130, %21 : vector<1x128xf32>
    %cst_34 = arith.constant 6.562500e+00 : f32
    %132 = vector.broadcast %cst_34 : f32 to vector<1x128xf32>
    %133 = arith.addf %131, %132 : vector<1x128xf32>
    %134 = arith.mulf %133, %21 : vector<1x128xf32>
    %cst_35 = arith.constant 0.000000e+00 : f32
    %135 = vector.broadcast %cst_35 : f32 to vector<1x128xf32>
    %136 = arith.addf %134, %135 : vector<1x128xf32>
    %137 = arith.mulf %136, %21 : vector<1x128xf32>
    %cst_36 = arith.constant -3.125000e-01 : f32
    %138 = vector.broadcast %cst_36 : f32 to vector<1x128xf32>
    %139 = arith.addf %137, %138 : vector<1x128xf32>
    %cst_37 = arith.constant 1.01710725 : f32
    %140 = vector.broadcast %cst_37 : f32 to vector<1x128xf32>
    %141 = arith.mulf %140, %139 : vector<1x128xf32>
    %cst_38 = arith.constant 8.662500e+01 : f32
    %142 = vector.broadcast %cst_38 : f32 to vector<1x128xf32>
    %143 = arith.mulf %142, %21 : vector<1x128xf32>
    %cst_39 = arith.constant 0.000000e+00 : f32
    %144 = vector.broadcast %cst_39 : f32 to vector<1x128xf32>
    %145 = arith.addf %143, %144 : vector<1x128xf32>
    %146 = arith.mulf %145, %21 : vector<1x128xf32>
    %cst_40 = arith.constant -7.875000e+01 : f32
    %147 = vector.broadcast %cst_40 : f32 to vector<1x128xf32>
    %148 = arith.addf %146, %147 : vector<1x128xf32>
    %149 = arith.mulf %148, %21 : vector<1x128xf32>
    %cst_41 = arith.constant 0.000000e+00 : f32
    %150 = vector.broadcast %cst_41 : f32 to vector<1x128xf32>
    %151 = arith.addf %149, %150 : vector<1x128xf32>
    %152 = arith.mulf %151, %21 : vector<1x128xf32>
    %cst_42 = arith.constant 1.312500e+01 : f32
    %153 = vector.broadcast %cst_42 : f32 to vector<1x128xf32>
    %154 = arith.addf %152, %153 : vector<1x128xf32>
    %155 = arith.mulf %154, %21 : vector<1x128xf32>
    %cst_43 = arith.constant 0.000000e+00 : f32
    %156 = vector.broadcast %cst_43 : f32 to vector<1x128xf32>
    %157 = arith.addf %155, %156 : vector<1x128xf32>
    %cst_44 = arith.constant 2.219510e-01 : f32
    %158 = vector.broadcast %cst_44 : f32 to vector<1x128xf32>
    %159 = arith.mulf %158, %157 : vector<1x128xf32>
    %160 = arith.mulf %159, %26 : vector<1x128xf32>
    %cst_45 = arith.constant 2.219510e-01 : f32
    %161 = vector.broadcast %cst_45 : f32 to vector<1x128xf32>
    %162 = arith.mulf %161, %157 : vector<1x128xf32>
    %163 = arith.mulf %162, %29 : vector<1x128xf32>
    %cst_46 = arith.constant 4.331250e+02 : f32
    %164 = vector.broadcast %cst_46 : f32 to vector<1x128xf32>
    %165 = arith.mulf %164, %21 : vector<1x128xf32>
    %cst_47 = arith.constant 0.000000e+00 : f32
    %166 = vector.broadcast %cst_47 : f32 to vector<1x128xf32>
    %167 = arith.addf %165, %166 : vector<1x128xf32>
    %168 = arith.mulf %167, %21 : vector<1x128xf32>
    %cst_48 = arith.constant -2.362500e+02 : f32
    %169 = vector.broadcast %cst_48 : f32 to vector<1x128xf32>
    %170 = arith.addf %168, %169 : vector<1x128xf32>
    %171 = arith.mulf %170, %21 : vector<1x128xf32>
    %cst_49 = arith.constant 0.000000e+00 : f32
    %172 = vector.broadcast %cst_49 : f32 to vector<1x128xf32>
    %173 = arith.addf %171, %172 : vector<1x128xf32>
    %174 = arith.mulf %173, %21 : vector<1x128xf32>
    %cst_50 = arith.constant 1.312500e+01 : f32
    %175 = vector.broadcast %cst_50 : f32 to vector<1x128xf32>
    %176 = arith.addf %174, %175 : vector<1x128xf32>
    %cst_51 = arith.constant 0.0350935347 : f32
    %177 = vector.broadcast %cst_51 : f32 to vector<1x128xf32>
    %178 = arith.mulf %177, %176 : vector<1x128xf32>
    %179 = arith.mulf %178, %32 : vector<1x128xf32>
    %cst_52 = arith.constant 0.0350935347 : f32
    %180 = vector.broadcast %cst_52 : f32 to vector<1x128xf32>
    %181 = arith.mulf %180, %176 : vector<1x128xf32>
    %182 = arith.mulf %181, %35 : vector<1x128xf32>
    %cst_53 = arith.constant 1.732500e+03 : f32
    %183 = vector.broadcast %cst_53 : f32 to vector<1x128xf32>
    %184 = arith.mulf %183, %21 : vector<1x128xf32>
    %cst_54 = arith.constant 0.000000e+00 : f32
    %185 = vector.broadcast %cst_54 : f32 to vector<1x128xf32>
    %186 = arith.addf %184, %185 : vector<1x128xf32>
    %187 = arith.mulf %186, %21 : vector<1x128xf32>
    %cst_55 = arith.constant -4.725000e+02 : f32
    %188 = vector.broadcast %cst_55 : f32 to vector<1x128xf32>
    %189 = arith.addf %187, %188 : vector<1x128xf32>
    %190 = arith.mulf %189, %21 : vector<1x128xf32>
    %cst_56 = arith.constant 0.000000e+00 : f32
    %191 = vector.broadcast %cst_56 : f32 to vector<1x128xf32>
    %192 = arith.addf %190, %191 : vector<1x128xf32>
    %cst_57 = arith.constant 0.0058489223 : f32
    %193 = vector.broadcast %cst_57 : f32 to vector<1x128xf32>
    %194 = arith.mulf %193, %192 : vector<1x128xf32>
    %195 = arith.mulf %194, %38 : vector<1x128xf32>
    %cst_58 = arith.constant 0.0058489223 : f32
    %196 = vector.broadcast %cst_58 : f32 to vector<1x128xf32>
    %197 = arith.mulf %196, %192 : vector<1x128xf32>
    %198 = arith.mulf %197, %41 : vector<1x128xf32>
    %cst_59 = arith.constant 5.197500e+03 : f32
    %199 = vector.broadcast %cst_59 : f32 to vector<1x128xf32>
    %200 = arith.mulf %199, %21 : vector<1x128xf32>
    %cst_60 = arith.constant 0.000000e+00 : f32
    %201 = vector.broadcast %cst_60 : f32 to vector<1x128xf32>
    %202 = arith.addf %200, %201 : vector<1x128xf32>
    %203 = arith.mulf %202, %21 : vector<1x128xf32>
    %cst_61 = arith.constant -4.725000e+02 : f32
    %204 = vector.broadcast %cst_61 : f32 to vector<1x128xf32>
    %205 = arith.addf %203, %204 : vector<1x128xf32>
    %cst_62 = arith.constant 0.00106786226 : f32
    %206 = vector.broadcast %cst_62 : f32 to vector<1x128xf32>
    %207 = arith.mulf %206, %205 : vector<1x128xf32>
    %208 = arith.mulf %207, %44 : vector<1x128xf32>
    %cst_63 = arith.constant 0.00106786226 : f32
    %209 = vector.broadcast %cst_63 : f32 to vector<1x128xf32>
    %210 = arith.mulf %209, %205 : vector<1x128xf32>
    %211 = arith.mulf %210, %47 : vector<1x128xf32>
    %cst_64 = arith.constant 1.039500e+04 : f32
    %212 = vector.broadcast %cst_64 : f32 to vector<1x128xf32>
    %213 = arith.mulf %212, %21 : vector<1x128xf32>
    %cst_65 = arith.constant 0.000000e+00 : f32
    %214 = vector.broadcast %cst_65 : f32 to vector<1x128xf32>
    %215 = arith.addf %213, %214 : vector<1x128xf32>
    %cst_66 = arith.constant 2.27668992E-4 : f32
    %216 = vector.broadcast %cst_66 : f32 to vector<1x128xf32>
    %217 = arith.mulf %216, %215 : vector<1x128xf32>
    %218 = arith.mulf %217, %50 : vector<1x128xf32>
    %cst_67 = arith.constant 2.27668992E-4 : f32
    %219 = vector.broadcast %cst_67 : f32 to vector<1x128xf32>
    %220 = arith.mulf %219, %215 : vector<1x128xf32>
    %221 = arith.mulf %220, %53 : vector<1x128xf32>
    %cst_68 = arith.constant 1.039500e+04 : f32
    %222 = vector.broadcast %cst_68 : f32 to vector<1x128xf32>
    %cst_69 = arith.constant 6.5722379E-5 : f32
    %223 = vector.broadcast %cst_69 : f32 to vector<1x128xf32>
    %224 = arith.mulf %223, %222 : vector<1x128xf32>
    %225 = arith.mulf %224, %56 : vector<1x128xf32>
    %cst_70 = arith.constant 6.5722379E-5 : f32
    %226 = vector.broadcast %cst_70 : f32 to vector<1x128xf32>
    %227 = arith.mulf %226, %222 : vector<1x128xf32>
    %228 = arith.mulf %227, %59 : vector<1x128xf32>
    %cst_71 = arith.constant 1.000000e+00 : f32
    %229 = vector.broadcast %cst_71 : f32 to vector<1x128xf32>
    %230 = tpu.concatenate %120, %113, %103, %90, %74, %87, %100, %110, %117, %228, %221, %211, %198, %182, %163, %141 in 0 : vector<1x128xf32>, vector<1x128xf32>, vector<1x128xf32>, vector<1x128xf32>, vector<1x128xf32>, vector<1x128xf32>, vector<1x128xf32>, vector<1x128xf32>, vector<1x128xf32>, vector<1x128xf32>, vector<1x128xf32>, vector<1x128xf32>, vector<1x128xf32>, vector<1x128xf32>, vector<1x128xf32>, vector<1x128xf32> -> vector<16x128xf32>
    %231 = tpu.concatenate %160, %179, %195, %208, %218, %225, %229 in 0 : vector<1x128xf32>, vector<1x128xf32>, vector<1x128xf32>, vector<1x128xf32>, vector<1x128xf32>, vector<1x128xf32>, vector<1x128xf32> -> vector<7x128xf32>
    %232 = tpu.concatenate %230, %231 in 0 : vector<16x128xf32>, vector<7x128xf32> -> vector<23x128xf32>
    %c128_i32 = arith.constant 128 : i32
    %233 = arith.muli %arg0, %c128_i32 : i32
    %234 = tpu.iota {dimensions = array<i32: 1>} : vector<128x128xi32>
    %235 = vector.broadcast %233 : i32 to vector<128x128xi32>
    %236 = arith.addi %235, %234 : vector<128x128xi32>
    %c0_72 = arith.constant 0 : index
    %c0_73 = arith.constant 0 : index
    %237 = vector.load %arg2[%c0_72, %c0_73] : memref<128x1xi32, #tpu.memory_space<vmem>>, vector<128x1xi32>
    %238 = vector.broadcast %237 : vector<128x1xi32> to vector<128x128xi32>
    %239 = arith.cmpi eq, %238, %236 : vector<128x128xi32>
    %240 = arith.extui %239 : vector<128x128xi1> to vector<128x128xi32>
    %241 = arith.sitofp %240 : vector<128x128xi32> to vector<128x128xf32>
    %c0_74 = arith.constant 0 : index
    %c0_75 = arith.constant 0 : index
    %242 = vector.load %arg10[%c0_74, %c0_75] : memref<23x128xf32, #tpu.memory_space<vmem>>, vector<23x128xf32>
    %cst_76 = arith.constant dense<0.000000e+00> : vector<23x128xf32>
    %243 = tpu.matmul %232, %241, %cst_76 {dimension_numbers = #tpu.dot_dimension_numbers<[1], [0], [0], [1], [0, 0, 1, 1], [], []>} : vector<23x128xf32>, vector<128x128xf32>, vector<23x128xf32> -> vector<23x128xf32>
    %244 = arith.addf %242, %243 : vector<23x128xf32>
    %c0_77 = arith.constant 0 : index
    %c0_78 = arith.constant 0 : index
    %245 = vector.load %arg10[%c0_77, %c0_78] : memref<23x128xf32, #tpu.memory_space<vmem>>, vector<23x128xf32>
    tpu.vector_store %arg10[%c0_77, %c0_78], %244 {strides = array<i32>} : memref<23x128xf32, #tpu.memory_space<vmem>>, vector<23x128xf32>,
    %c0_i32_79 = arith.constant 0 : i32
    %246 = arith.cmpi eq, %arg1, %c0_i32_79 : i32
    %247 = arith.extui %246 : i1 to i32
    %c0_i32_80 = arith.constant 0 : i32
    %248 = arith.cmpi ne, %247, %c0_i32_80 : i32
    scf.if %248 {
      %c0_81 = arith.constant 0 : index
      %c0_82 = arith.constant 0 : index
      %249 = vector.load %arg10[%c0_81, %c0_82] : memref<23x128xf32, #tpu.memory_space<vmem>>, vector<23x128xf32>
      %250 = vector.extract_strided_slice %249 {offsets = [22, 0], sizes = [1, 128], strides = [1, 1]} : vector<23x128xf32> to vector<1x128xf32>
      %cst_83 = arith.constant 1.000000e+00 : f32
      %251 = vector.broadcast %cst_83 : f32 to vector<1x128xf32>
      %252 = arith.maximumf %250, %251 : vector<1x128xf32>
      %cst_84 = arith.constant 1.000000e+00 : f32
      %253 = vector.broadcast %cst_84 : f32 to vector<1x128xf32>
      %254 = arith.divf %253, %252 : vector<1x128xf32>
      %255 = vector.extract_strided_slice %249 {offsets = [0, 0], sizes = [9, 128], strides = [1, 1]} : vector<23x128xf32> to vector<9x128xf32>
      %256 = vector.broadcast %254 : vector<1x128xf32> to vector<9x128xf32>
      %257 = arith.mulf %255, %256 : vector<9x128xf32>
      %c0_85 = arith.constant 0 : index
      %c0_86 = arith.constant 0 : index
      %258 = vector.load %arg4[%c0_85, %c0_86] : memref<9x81xf32, #tpu.memory_space<vmem>>, vector<9x81xf32>
      %259 = arith.mulf %257, %257 : vector<9x128xf32>
      %cst_87 = arith.constant dense<0.000000e+00> : vector<128xf32>
      %260 = vector.multi_reduction <add>, %259, %cst_87 [0] : vector<9x128xf32> to vector<128xf32>
      %261 = vector.shape_cast %260 : vector<128xf32> to vector<1x128xf32>
      %cst_88 = arith.constant 1.39626336 : f32
      %262 = vector.broadcast %cst_88 : f32 to vector<1x128xf32>
      %263 = arith.mulf %261, %262 : vector<1x128xf32>
      %264 = math.sqrt %263 : vector<1x128xf32>
      %265 = vector.extract_strided_slice %257 {offsets = [0, 0], sizes = [1, 128], strides = [1, 1]} : vector<9x128xf32> to vector<1x128xf32>
      %266 = vector.broadcast %265 : vector<1x128xf32> to vector<9x128xf32>
      %267 = arith.mulf %257, %266 : vector<9x128xf32>
      %268 = vector.extract_strided_slice %257 {offsets = [1, 0], sizes = [1, 128], strides = [1, 1]} : vector<9x128xf32> to vector<1x128xf32>
      %269 = vector.broadcast %268 : vector<1x128xf32> to vector<9x128xf32>
      %270 = arith.mulf %257, %269 : vector<9x128xf32>
      %271 = vector.extract_strided_slice %257 {offsets = [2, 0], sizes = [1, 128], strides = [1, 1]} : vector<9x128xf32> to vector<1x128xf32>
      %272 = vector.broadcast %271 : vector<1x128xf32> to vector<9x128xf32>
      %273 = arith.mulf %257, %272 : vector<9x128xf32>
      %274 = vector.extract_strided_slice %257 {offsets = [3, 0], sizes = [1, 128], strides = [1, 1]} : vector<9x128xf32> to vector<1x128xf32>
      %275 = vector.broadcast %274 : vector<1x128xf32> to vector<9x128xf32>
      %276 = arith.mulf %257, %275 : vector<9x128xf32>
      %277 = vector.extract_strided_slice %257 {offsets = [4, 0], sizes = [1, 128], strides = [1, 1]} : vector<9x128xf32> to vector<1x128xf32>
      %278 = vector.broadcast %277 : vector<1x128xf32> to vector<9x128xf32>
      %279 = arith.mulf %257, %278 : vector<9x128xf32>
      %280 = vector.extract_strided_slice %257 {offsets = [5, 0], sizes = [1, 128], strides = [1, 1]} : vector<9x128xf32> to vector<1x128xf32>
      %281 = vector.broadcast %280 : vector<1x128xf32> to vector<9x128xf32>
      %282 = arith.mulf %257, %281 : vector<9x128xf32>
      %283 = vector.extract_strided_slice %257 {offsets = [6, 0], sizes = [1, 128], strides = [1, 1]} : vector<9x128xf32> to vector<1x128xf32>
      %284 = vector.broadcast %283 : vector<1x128xf32> to vector<9x128xf32>
      %285 = arith.mulf %257, %284 : vector<9x128xf32>
      %286 = vector.extract_strided_slice %257 {offsets = [7, 0], sizes = [1, 128], strides = [1, 1]} : vector<9x128xf32> to vector<1x128xf32>
      %287 = vector.broadcast %286 : vector<1x128xf32> to vector<9x128xf32>
      %288 = arith.mulf %257, %287 : vector<9x128xf32>
      %289 = vector.extract_strided_slice %257 {offsets = [8, 0], sizes = [1, 128], strides = [1, 1]} : vector<9x128xf32> to vector<1x128xf32>
      %290 = vector.broadcast %289 : vector<1x128xf32> to vector<9x128xf32>
      %291 = arith.mulf %257, %290 : vector<9x128xf32>
      %292 = tpu.concatenate %267, %270, %273, %276, %279, %282, %285, %288, %291 in 0 : vector<9x128xf32>, vector<9x128xf32>, vector<9x128xf32>, vector<9x128xf32>, vector<9x128xf32>, vector<9x128xf32>, vector<9x128xf32>, vector<9x128xf32>, vector<9x128xf32> -> vector<81x128xf32>
      %cst_89 = arith.constant dense<0.000000e+00> : vector<9x128xf32>
      %293 = tpu.matmul %258, %292, %cst_89 {dimension_numbers = #tpu.dot_dimension_numbers<[1], [0], [0], [1], [0, 0, 1, 1], [], []>} : vector<9x81xf32>, vector<81x128xf32>, vector<9x128xf32> -> vector<9x128xf32>
      %294 = arith.mulf %257, %293 : vector<9x128xf32>
      %cst_90 = arith.constant dense<0.000000e+00> : vector<128xf32>
      %295 = vector.multi_reduction <add>, %294, %cst_90 [0] : vector<9x128xf32> to vector<128xf32>
      %296 = vector.shape_cast %295 : vector<128xf32> to vector<1x128xf32>
      %cst_91 = arith.constant 9.99999968E-21 : f32
      %297 = vector.broadcast %cst_91 : f32 to vector<1x128xf32>
      %298 = arith.maximumf %261, %297 : vector<1x128xf32>
      %299 = math.rsqrt %298 : vector<1x128xf32>
      %cst_92 = arith.constant 0.000000e+00 : f32
      %300 = vector.broadcast %cst_92 : f32 to vector<1x128xf32>
      %301 = arith.cmpf ogt, %261, %300 : vector<1x128xf32>
      %302 = arith.mulf %299, %299 : vector<1x128xf32>
      %303 = arith.mulf %302, %299 : vector<1x128xf32>
      %304 = arith.mulf %296, %303 : vector<1x128xf32>
      %cst_93 = arith.constant 0.000000e+00 : f32
      %305 = vector.broadcast %cst_93 : f32 to vector<1x128xf32>
      %306 = arith.select %301, %304, %305 : vector<1x128xi1>, vector<1x128xf32>
      %307 = vector.extract_strided_slice %249 {offsets = [9, 0], sizes = [13, 128], strides = [1, 1]} : vector<23x128xf32> to vector<13x128xf32>
      %308 = vector.broadcast %254 : vector<1x128xf32> to vector<13x128xf32>
      %309 = arith.mulf %307, %308 : vector<13x128xf32>
      %c0_94 = arith.constant 0 : index
      %c0_95 = arith.constant 0 : index
      %310 = vector.load %arg5[%c0_94, %c0_95] : memref<13x169xf32, #tpu.memory_space<vmem>>, vector<13x169xf32>
      %311 = arith.mulf %309, %309 : vector<13x128xf32>
      %cst_96 = arith.constant dense<0.000000e+00> : vector<128xf32>
      %312 = vector.multi_reduction <add>, %311, %cst_96 [0] : vector<13x128xf32> to vector<128xf32>
      %313 = vector.shape_cast %312 : vector<128xf32> to vector<1x128xf32>
      %cst_97 = arith.constant 0.966643869 : f32
      %314 = vector.broadcast %cst_97 : f32 to vector<1x128xf32>
      %315 = arith.mulf %313, %314 : vector<1x128xf32>
      %316 = math.sqrt %315 : vector<1x128xf32>
      %317 = vector.extract_strided_slice %309 {offsets = [0, 0], sizes = [1, 128], strides = [1, 1]} : vector<13x128xf32> to vector<1x128xf32>
      %318 = vector.broadcast %317 : vector<1x128xf32> to vector<13x128xf32>
      %319 = arith.mulf %309, %318 : vector<13x128xf32>
      %320 = vector.extract_strided_slice %309 {offsets = [1, 0], sizes = [1, 128], strides = [1, 1]} : vector<13x128xf32> to vector<1x128xf32>
      %321 = vector.broadcast %320 : vector<1x128xf32> to vector<13x128xf32>
      %322 = arith.mulf %309, %321 : vector<13x128xf32>
      %323 = vector.extract_strided_slice %309 {offsets = [2, 0], sizes = [1, 128], strides = [1, 1]} : vector<13x128xf32> to vector<1x128xf32>
      %324 = vector.broadcast %323 : vector<1x128xf32> to vector<13x128xf32>
      %325 = arith.mulf %309, %324 : vector<13x128xf32>
      %326 = vector.extract_strided_slice %309 {offsets = [3, 0], sizes = [1, 128], strides = [1, 1]} : vector<13x128xf32> to vector<1x128xf32>
      %327 = vector.broadcast %326 : vector<1x128xf32> to vector<13x128xf32>
      %328 = arith.mulf %309, %327 : vector<13x128xf32>
      %329 = vector.extract_strided_slice %309 {offsets = [4, 0], sizes = [1, 128], strides = [1, 1]} : vector<13x128xf32> to vector<1x128xf32>
      %330 = vector.broadcast %329 : vector<1x128xf32> to vector<13x128xf32>
      %331 = arith.mulf %309, %330 : vector<13x128xf32>
      %332 = vector.extract_strided_slice %309 {offsets = [5, 0], sizes = [1, 128], strides = [1, 1]} : vector<13x128xf32> to vector<1x128xf32>
      %333 = vector.broadcast %332 : vector<1x128xf32> to vector<13x128xf32>
      %334 = arith.mulf %309, %333 : vector<13x128xf32>
      %335 = vector.extract_strided_slice %309 {offsets = [6, 0], sizes = [1, 128], strides = [1, 1]} : vector<13x128xf32> to vector<1x128xf32>
      %336 = vector.broadcast %335 : vector<1x128xf32> to vector<13x128xf32>
      %337 = arith.mulf %309, %336 : vector<13x128xf32>
      %338 = vector.extract_strided_slice %309 {offsets = [7, 0], sizes = [1, 128], strides = [1, 1]} : vector<13x128xf32> to vector<1x128xf32>
      %339 = vector.broadcast %338 : vector<1x128xf32> to vector<13x128xf32>
      %340 = arith.mulf %309, %339 : vector<13x128xf32>
      %341 = vector.extract_strided_slice %309 {offsets = [8, 0], sizes = [1, 128], strides = [1, 1]} : vector<13x128xf32> to vector<1x128xf32>
      %342 = vector.broadcast %341 : vector<1x128xf32> to vector<13x128xf32>
      %343 = arith.mulf %309, %342 : vector<13x128xf32>
      %344 = vector.extract_strided_slice %309 {offsets = [9, 0], sizes = [1, 128], strides = [1, 1]} : vector<13x128xf32> to vector<1x128xf32>
      %345 = vector.broadcast %344 : vector<1x128xf32> to vector<13x128xf32>
      %346 = arith.mulf %309, %345 : vector<13x128xf32>
      %347 = vector.extract_strided_slice %309 {offsets = [10, 0], sizes = [1, 128], strides = [1, 1]} : vector<13x128xf32> to vector<1x128xf32>
      %348 = vector.broadcast %347 : vector<1x128xf32> to vector<13x128xf32>
      %349 = arith.mulf %309, %348 : vector<13x128xf32>
      %350 = vector.extract_strided_slice %309 {offsets = [11, 0], sizes = [1, 128], strides = [1, 1]} : vector<13x128xf32> to vector<1x128xf32>
      %351 = vector.broadcast %350 : vector<1x128xf32> to vector<13x128xf32>
      %352 = arith.mulf %309, %351 : vector<13x128xf32>
      %353 = vector.extract_strided_slice %309 {offsets = [12, 0], sizes = [1, 128], strides = [1, 1]} : vector<13x128xf32> to vector<1x128xf32>
      %354 = vector.broadcast %353 : vector<1x128xf32> to vector<13x128xf32>
      %355 = arith.mulf %309, %354 : vector<13x128xf32>
      %356 = tpu.concatenate %319, %322, %325, %328, %331, %334, %337, %340, %343, %346, %349, %352, %355 in 0 : vector<13x128xf32>, vector<13x128xf32>, vector<13x128xf32>, vector<13x128xf32>, vector<13x128xf32>, vector<13x128xf32>, vector<13x128xf32>, vector<13x128xf32>, vector<13x128xf32>, vector<13x128xf32>, vector<13x128xf32>, vector<13x128xf32>, vector<13x128xf32> -> vector<169x128xf32>
      %cst_98 = arith.constant dense<0.000000e+00> : vector<13x128xf32>
      %357 = tpu.matmul %310, %356, %cst_98 {dimension_numbers = #tpu.dot_dimension_numbers<[1], [0], [0], [1], [0, 0, 1, 1], [], []>} : vector<13x169xf32>, vector<169x128xf32>, vector<13x128xf32> -> vector<13x128xf32>
      %358 = arith.mulf %309, %357 : vector<13x128xf32>
      %cst_99 = arith.constant dense<0.000000e+00> : vector<128xf32>
      %359 = vector.multi_reduction <add>, %358, %cst_99 [0] : vector<13x128xf32> to vector<128xf32>
      %360 = vector.shape_cast %359 : vector<128xf32> to vector<1x128xf32>
      %cst_100 = arith.constant 9.99999968E-21 : f32
      %361 = vector.broadcast %cst_100 : f32 to vector<1x128xf32>
      %362 = arith.maximumf %313, %361 : vector<1x128xf32>
      %363 = math.rsqrt %362 : vector<1x128xf32>
      %cst_101 = arith.constant 0.000000e+00 : f32
      %364 = vector.broadcast %cst_101 : f32 to vector<1x128xf32>
      %365 = arith.cmpf ogt, %313, %364 : vector<1x128xf32>
      %366 = arith.mulf %363, %363 : vector<1x128xf32>
      %367 = arith.mulf %366, %363 : vector<1x128xf32>
      %368 = arith.mulf %360, %367 : vector<1x128xf32>
      %cst_102 = arith.constant 0.000000e+00 : f32
      %369 = vector.broadcast %cst_102 : f32 to vector<1x128xf32>
      %370 = arith.select %365, %368, %369 : vector<1x128xi1>, vector<1x128xf32>
      %371 = tpu.concatenate %264, %316, %306, %370 in 0 : vector<1x128xf32>, vector<1x128xf32>, vector<1x128xf32>, vector<1x128xf32> -> vector<4x128xf32>
      %c0_103 = arith.constant 0 : index
      %c0_104 = arith.constant 0 : index
      %372 = vector.load %arg6[%c0_103, %c0_104] : memref<64x4xf32, #tpu.memory_space<vmem>>, vector<64x4xf32>
      %cst_105 = arith.constant dense<0.000000e+00> : vector<64x128xf32>
      %373 = tpu.matmul %372, %371, %cst_105 {dimension_numbers = #tpu.dot_dimension_numbers<[1], [0], [0], [1], [0, 0, 1, 1], [], []>} : vector<64x4xf32>, vector<4x128xf32>, vector<64x128xf32> -> vector<64x128xf32>
      %cst_106 = arith.constant 5.000000e-01 : f32
      %374 = vector.broadcast %cst_106 : f32 to vector<64x128xf32>
      %375 = arith.mulf %373, %374 : vector<64x128xf32>
      %cst_107 = arith.constant 1.67653251 : f32
      %376 = vector.broadcast %cst_107 : f32 to vector<64x128xf32>
      %377 = arith.mulf %376, %375 : vector<64x128xf32>
      %378 = arith.negf %375 : vector<64x128xf32>
      %379 = math.exp %378 : vector<64x128xf32>
      %cst_108 = arith.constant 1.000000e+00 : f32
      %380 = vector.broadcast %cst_108 : f32 to vector<64x128xf32>
      %381 = arith.addf %380, %379 : vector<64x128xf32>
      %382 = arith.divf %380, %381 : vector<64x128xf32>
      %383 = arith.mulf %377, %382 : vector<64x128xf32>
      %c0_109 = arith.constant 0 : index
      %c0_110 = arith.constant 0 : index
      %384 = vector.load %arg7[%c0_109, %c0_110] : memref<4x64xf32, #tpu.memory_space<vmem>>, vector<4x64xf32>
      %cst_111 = arith.constant dense<0.000000e+00> : vector<4x128xf32>
      %385 = tpu.matmul %384, %383, %cst_111 {dimension_numbers = #tpu.dot_dimension_numbers<[1], [0], [0], [1], [0, 0, 1, 1], [], []>} : vector<4x64xf32>, vector<64x128xf32>, vector<4x128xf32> -> vector<4x128xf32>
      %cst_112 = arith.constant 1.250000e-01 : f32
      %386 = vector.broadcast %cst_112 : f32 to vector<4x128xf32>
      %387 = arith.mulf %385, %386 : vector<4x128xf32>
      %c0_113 = arith.constant 0 : index
      %c0_114 = arith.constant 0 : index
      %388 = vector.load %arg8[%c0_113, %c0_114] : memref<4x128xf32, #tpu.memory_space<vmem>>, vector<4x128xf32>
      tpu.vector_store %arg8[%c0_113, %c0_114], %387 {strides = array<i32>} : memref<4x128xf32, #tpu.memory_space<vmem>>, vector<4x128xf32>,
      %c0_115 = arith.constant 0 : index
      %c0_116 = arith.constant 0 : index
      %389 = vector.load %arg9[%c0_115, %c0_116] : memref<4x128xf32, #tpu.memory_space<vmem>>, vector<4x128xf32>
      tpu.vector_store %arg9[%c0_115, %c0_116], %371 {strides = array<i32>} : memref<4x128xf32, #tpu.memory_space<vmem>>, vector<4x128xf32>,
    } else {
    }
    return
  }
  func.func @transform_0(%arg0: i32, %arg1: i32) -> (i32, i32) {
    %c0_i32 = arith.constant 0 : i32
    %c0_i32_0 = arith.constant 0 : i32
    return %arg1, %c0_i32 : i32, i32
  }
  func.func @transform_1(%arg0: i32, %arg1: i32) -> (i32, i32) {
    %c0_i32 = arith.constant 0 : i32
    %c0_i32_0 = arith.constant 0 : i32
    return %c0_i32, %arg1 : i32, i32
  }
  func.func @transform_2(%arg0: i32, %arg1: i32) -> (i32, i32) {
    %c0_i32 = arith.constant 0 : i32
    %c0_i32_0 = arith.constant 0 : i32
    %c0_i32_1 = arith.constant 0 : i32
    return %c0_i32, %c0_i32_0 : i32, i32
  }
  func.func @transform_3(%arg0: i32, %arg1: i32) -> (i32, i32) {
    %c0_i32 = arith.constant 0 : i32
    %c0_i32_0 = arith.constant 0 : i32
    %c0_i32_1 = arith.constant 0 : i32
    return %c0_i32, %c0_i32_0 : i32, i32
  }
  func.func @transform_4(%arg0: i32, %arg1: i32) -> (i32, i32) {
    %c0_i32 = arith.constant 0 : i32
    %c0_i32_0 = arith.constant 0 : i32
    %c0_i32_1 = arith.constant 0 : i32
    return %c0_i32, %c0_i32_0 : i32, i32
  }
  func.func @transform_5(%arg0: i32, %arg1: i32) -> (i32, i32) {
    %c0_i32 = arith.constant 0 : i32
    %c0_i32_0 = arith.constant 0 : i32
    %c0_i32_1 = arith.constant 0 : i32
    return %c0_i32, %c0_i32_0 : i32, i32
  }
  func.func @transform_6(%arg0: i32, %arg1: i32) -> (i32, i32) {
    %c0_i32 = arith.constant 0 : i32
    %c0_i32_0 = arith.constant 0 : i32
    return %c0_i32, %arg0 : i32, i32
  }
  func.func @transform_7(%arg0: i32, %arg1: i32) -> (i32, i32) {
    %c0_i32 = arith.constant 0 : i32
    %c0_i32_0 = arith.constant 0 : i32
    return %c0_i32, %arg0 : i32, i32
  }
}

</mosaic_0001>

<bundles_post_ra>
// kernel: steinhardt_net_forward.1
= control target key start
LH: loop header
LB: loop body
LE: loop exit
PB: predicated region body
PF: predicated region fallthrough
CT: control target
= control target key end

     0   :  { %13 = vsyncpa [#allocation4], 0  ;;  %v1802_v2 = vmov 0   ;;  %s2422_s0 = inlined_call_operand.vmem [shape: s32[128,1], index: 0, kind: input, shape index: {}]   ;;  %s2423_s1 = inlined_call_operand.vmem [shape: f32[3,128], index: 1, kind: input, shape index: {}]   ;;  %s2424_s2 = inlined_call_operand.vmem [shape: f32[9,81], index: 2, kind: input, shape index: {}]   ;;  %s2425_s3 = inlined_call_operand.vmem [shape: f32[13,169], index: 3, kind: input, shape index: {}]   ;;  %s2426_s4 = inlined_call_operand.vmem [shape: f32[64,4], index: 4, kind: input, shape index: {}]   ;;  %s2427_s5 = inlined_call_operand.vmem [shape: f32[4,64], index: 5, kind: input, shape index: {}]   ;;  %s2428_s6 = inlined_call_operand.hbm [shape: f32[4,128], index: 6, kind: output, shape index: {0}]   ;;  %s2429_s7 = inlined_call_operand.hbm [shape: f32[4,128], index: 7, kind: output, shape index: {1}]  }
   0x1   :  { %v314_v0 = vld [vmem:[%s2422_s0 + $0x10] sm:$0xff]  ;;  %v312_v1 = vld [vmem:[%s2422_s0] sm:$0xff]  ;;  %1709 = vset.pattern.permute.xlu1 %v1802_v2  ;;  %1708 = vset.pattern.permute.xlu0 %v1802_v2  ;;  %v315_v3 = vld [vmem:[%s2422_s0 + $0x18] sm:$0xff] }
   0x2   :  { %335 = vperm.xlu1 %1709, %v314_v0   ;;  %329 = vperm.xlu0 %1708, %v312_v1   ;;  %v313_v4 = vld [vmem:[%s2422_s0 + $0x8] sm:$0xff] }
   0x3   :  { %14 = vsyncpa [#allocation6], 0  ;;  %v317_v5 = vld [vmem:[%s2422_s0 + $0x28] sm:$0xff]  ;;  %v316_v6 = vld [vmem:[%s2422_s0 + $0x20] sm:$0xff]  ;;  %v1803_v7 = vmov 0.0|0.0   ;;  %vm1804_vm0 = vmmov 0  }
   0x4   :  { %1610 = vmatprep.subr.bf16.mxu0 %v1803_v7  ;;  %v319_v8 = vld [vmem:[%s2422_s0 + $0x38] sm:$0xff]  ;;  %v318_v9 = vld [vmem:[%s2422_s0 + $0x30] sm:$0xff]  ;;  %v321_v10 = vld [vmem:[%s2422_s0 + $0x48] sm:$0xff]  ;;  %v1805_v18 = vmov 0.0   ;;  %vm265_vm8 = vcmask 1040384   ;;  %vm267_vm12 = vcmask 1041408  }
   0x5   :  { %v320_v11 = vld [vmem:[%s2422_s0 + $0x40] sm:$0xff]  ;;  %v323_v12 = vld [vmem:[%s2422_s0 + $0x58] sm:$0xff]  ;;  %v322_v13 = vld [vmem:[%s2422_s0 + $0x50] sm:$0xff]  ;;  %1543 = vmatprep.mubr.msk.f32.mxu0 %vm1804_vm0, %v1805_v18  ;;  %33 = vst [vmem:[#allocation2 + $0x10] sm:$0x7f] %v1805_v18  ;;  %s1808_s12 = smov [#allocation5]  }
   0x6   :  { %338 = vperm.xlu1 %1709, %v315_v3   ;;  %332 = vperm.xlu0 %1708, %v313_v4   ;;  %v325_v14 = vld [vmem:[%s2422_s0 + $0x68] sm:$0xff]  ;;  %v324_v15 = vld [vmem:[%s2422_s0 + $0x60] sm:$0xff]  ;;  %v327_v16 = vld [vmem:[%s2422_s0 + $0x78] sm:$0xff]  ;;  %s1393_s13 = sshll.u32 %s1808_s12, 4  ;;  %s1394_s13 = int_to_ptr.vmem [resolvable:$true] %s1393_s13 }
   0x7   :  { %v326_v17 = vld [vmem:[%s2422_s0 + $0x70] sm:$0xff]  ;;  %v34_v19 = vld [vmem:[%s2423_s1] sm:$0x7]  ;;  %s1754_s14 = scalar_lea.vmem %s1394_s13, 64  ;;  %p1759_p1 = scmp.lt.s32.totalorder %s1394_s13, %s1394_s13 }
   0x8   :  { %v35_v20 = vmul.f32 %v34_v19, %v34_v19  ;;  %p1755_p0 = scmp.ne.s32.totalorder %s1394_s13, %s1754_s14  ;;  %p1760_p2 = scmp.lt.s32.totalorder %s1754_s14, %s1754_s14 }
   0xa   :  { %344 = vperm.xlu1 %1709, %v317_v5   ;;  %341 = vperm.xlu0 %1708, %v316_v6   ;;  %v37_v21 = vrot.slane %v35_v20, 1  ;;  %v40_v23 = vrot.slane %v35_v20, 2  ;;  %v308_v6 = vlaneseq  ;;  %p1761_p3 = por %p1760_p2, %p1759_p1 }
   0xc   :  { %v39_v22 = vadd.f32 %v37_v21, %v35_v20  ;;  %p1762_p4 = pnand %p1761_p3, %p1755_p0 }
   0xe   :  { %350 = vperm.xlu1 %1709, %v319_v8   ;;  %347 = vperm.xlu0 %1708, %v318_v9   ;;  %v42_v24 = vadd.f32 %v40_v23, %v39_v22 }
  0x10   :  { %v44_v25 = vmax.f32 %v42_v24, 1e-30  ;;  %vm43_vm1 = vcmp.gt.f32.partialorder %v42_v24, 0.0 }
  0x12   :  { %356 = vperm.xlu1 %1709, %v321_v10   ;;  %353 = vperm.xlu0 %1708, %v320_v11   ;;  %1710 = vrsqrt.f32 %v44_v25  ;;  %v1976_v25 = vand.u32 127, %v308_v6 }
  0x16   :  { %362 = vperm.xlu1 %1709, %v323_v12   ;;  %359 = vperm.xlu0 %1708, %v322_v13  }
  0x1a   :  { %368 = vperm.xlu1 %1709, %v325_v14   ;;  %365 = vperm.xlu0 %1708, %v324_v15  }
  0x1c   :  { %v1711_v26 = vpop.eup %1710 }
  0x1d   :  { %v46_v27 = vsel %vm43_vm1, %v1711_v26, 0.0  ;;  %vm269_vm1 = vcmask 1042432  }
  0x1e   :  { %374 = vperm.xlu1 %1709, %v327_v16   ;;  %371 = vperm.xlu0 %1708, %v326_v17   ;;  %v1905_v28 = vmul.f32 %v46_v27, %v34_v19  ;;  %v49_v29 = vrot.slane %v46_v27, 7  ;;  %v52_v47 = vrot.slane %v46_v27, 6 }
  0x20   :  { %v51_v30 = vmul.f32 %v49_v29, %v34_v19  ;;  %v60_v31 = vmul.f32 0.0, %v1905_v28  ;;  %v76_v36 = vrot.slane %v1905_v28, 7  ;;  %v1934_v52 = vmul.f32 %v52_v47, %v34_v19 }
  0x22   :  { %v55_v32 = vmul.f32 0.0, %v51_v30  ;;  %v62_v33 = vrot.slane %v60_v31, 7  ;;  %v1915_v39 = vrot.slane %v51_v30, 1  ;;  %v107_v55 = vmul.f32 4.375, %v1934_v52 }
  0x23   :  { %v170_v56 = vmul.f32 86.625, %v1934_v52  ;;  %v183_v61 = vmul.f32 433.125, %v1934_v52  ;;  %v116_v62 = vmul.f32 17.5, %v1934_v52  ;;  %v157_v5 = vmul.f32 14.4375, %v1934_v52 }
  0x24   :  { %v57_v34 = vrot.slane %v55_v32, 1  ;;  %v1908_v35 = vadd.f32 %v62_v33, %v51_v30  ;;  %v109_v63 = vmul.f32 %v107_v55, %v1934_v52  ;;  %v131_v9 = vmul.f32 52.5, %v1934_v52 }
  0x25   :  { %v172_v0 = vmul.f32 %v170_v56, %v1934_v52  ;;  %v185_v3 = vmul.f32 %v183_v61, %v1934_v52  ;;  %v118_v4 = vmul.f32 %v116_v62, %v1934_v52  ;;  %v144_v15 = vmul.f32 105.0, %v1934_v52 }
  0x26   :  { %v1912_v37 = vsub.f32 %v1905_v28, %v57_v34  ;;  %v66_v38 = vmul.f32 %v1908_v35, %v51_v30  ;;  %v78_v40 = vmul.f32 %v76_v36, %v1908_v35  ;;  %v110_v8 = vadd.f32 -3.75, %v109_v63 }
  0x27   :  { %v173_v10 = vadd.f32 -78.75, %v172_v0  ;;  %v186_v16 = vadd.f32 -236.25, %v185_v3  ;;  %v119_v20 = vadd.f32 -7.5, %v118_v4  ;;  %v159_v21 = vmul.f32 %v157_v5, %v1934_v52 }
  0x28   :  { %v65_v41 = vmul.f32 %v1912_v37, %v1905_v28  ;;  %v68_v42 = vrot.slane %v66_v38, 1  ;;  %v74_v43 = vmul.f32 %v1915_v39, %v1912_v37  ;;  %v80_v44 = vrot.slane %v78_v40, 1 }
  0x29   :  { %v133_v22 = vmul.f32 %v131_v9, %v1934_v52  ;;  %v194_v23 = vmul.f32 1732.5, %v1934_v52  ;;  %v174_v24 = vmul.f32 %v173_v10, %v1934_v52  ;;  %v111_v26 = vmul.f32 %v110_v8, %v1934_v52 }
  0x2a   :  { %v1922_v45 = vsub.f32 %v65_v41, %v68_v42  ;;  %v1924_v46 = vadd.f32 %v80_v44, %v74_v43  ;;  %v1983_v30 = vmul.f32 0.016858388, %v144_v15  ;;  %v187_v32 = vmul.f32 %v186_v16, %v1934_v52 }
  0x2b   :  { %v120_v36 = vmul.f32 %v119_v20, %v1934_v52  ;;  %v160_v38 = vadd.f32 -19.6875, %v159_v21  ;;  %v203_v40 = vmul.f32 5197.5, %v1934_v52  ;;  %v134_v41 = vadd.f32 -7.5, %v133_v22 }
  0x2c   :  { %v83_v48 = vmul.f32 %v1922_v45, %v1905_v28  ;;  %v84_v49 = vmul.f32 %v1924_v46, %v1915_v39  ;;  %v86_v50 = vmul.f32 %v1915_v39, %v1922_v45  ;;  %v87_v51 = vmul.f32 %v1924_v46, %v1905_v28 }
  0x2d   :  { %v196_v42 = vmul.f32 %v194_v23, %v1934_v52  ;;  %v176_v43 = vmul.f32 %v174_v24, %v1934_v52  ;;  %v113_v44 = vmul.f32 %v111_v26, %v1934_v52  ;;  %v135_v61 = vmul.f32 0.063078314, %v134_v41 }
  0x2e   :  { %v1936_v53 = vsub.f32 %v83_v48, %v84_v49  ;;  %v1938_v54 = vadd.f32 %v87_v51, %v86_v50  ;;  %v189_v50 = vmul.f32 %v187_v32, %v1934_v52  ;;  %v1806_v51 = vmov 1.0|1.0  }
  0x2f   :  { %v177_v62 = vadd.f32 13.125, %v176_v43  ;;  %v114_v63 = vadd.f32 0.375, %v113_v44  ;;  %v141_v0 = vrot.slane %v1924_v46, 6  ;;  %v197_v3 = vadd.f32 -472.5, %v196_v42 }
  0x30   :  { %v89_v57 = vmul.f32 %v1936_v53, %v1905_v28  ;;  %v90_v58 = vmul.f32 %v1938_v54, %v1915_v39  ;;  %v92_v59 = vmul.f32 %v1936_v53, %v1915_v39  ;;  %v93_v60 = vmul.f32 %v1938_v54, %v1905_v28 }
  0x31   :  { %v152_v31 = vrot.slane %v1938_v54, 6  ;;  %v190_v8 = vadd.f32 13.125, %v189_v50  ;;  %v178_v16 = vmul.f32 %v177_v62, %v1934_v52  ;;  %v143_v20 = vmul.f32 %v141_v0, %v135_v61 }
  0x32   :  { %v1954_v1 = vsub.f32 %v89_v57, %v90_v58  ;;  %v1956_v2 = vadd.f32 %v93_v60, %v92_v59  ;;  %v161_v57 = vmul.f32 %v160_v38, %v1934_v52  ;;  %v205_v58 = vmul.f32 %v203_v40, %v1934_v52 }
  0x33   :  { %v154_v49 = vmul.f32 %v152_v31, %v1983_v30  ;;  %v2008_v59 = vmul.f32 0.26761863, %v120_v36  ;;  %v128_v60 = vrot.slane %v1908_v35, 7  ;;  %v198_v21 = vmul.f32 %v197_v3, %v1934_v52 }
  0x34   :  { %v95_v11 = vmul.f32 %v1954_v1, %v1905_v28  ;;  %v96_v12 = vmul.f32 %v1956_v2, %v1915_v39  ;;  %v98_v13 = vmul.f32 %v1954_v1, %v1915_v39  ;;  %v99_v14 = vmul.f32 %v1956_v2, %v1905_v28 }
  0x35   :  { %v156_v5 = vmul.f32 0.6258357, %v1956_v2  ;;  %v230_v9 = vrot.slane %v154_v49, 1  ;;  %v130_v15 = vmul.f32 %v128_v60, %v2008_v59  ;;  %v213_v24 = vrot.slane %v1956_v2, 6 }
  0x36   :  { %v1979_v27 = vsub.f32 %v95_v11, %v96_v12  ;;  %v1981_v29 = vadd.f32 %v99_v14, %v98_v13  ;;  %v163_v12 = vmul.f32 %v161_v57, %v1934_v52  ;;  %v206_v13 = vadd.f32 -472.5, %v205_v58 }
  0x37   :  { %v124_v14 = vrot.slane %v1912_v37, 6  ;;  %v191_v37 = vmul.f32 0.035093535, %v190_v8  ;;  %v266_v23 = vsel %vm265_vm8, %v156_v5, %v230_v9  ;;  %v137_v36 = vrot.slane %v1922_v45, 6 }
  0x38   :  { %v104_v47 = vmul.f32 %v1979_v27, %v1915_v39  ;;  %v105_v48 = vmul.f32 %v1981_v29, %v1905_v28  ;;  %v2044_v38 = vmul.f32 0.221951, %v178_v16  ;;  %v224_v2 = vrot.slane %v1981_v29, 6 }
  0x39   :  { %v148_v41 = vrot.slane %v1936_v53, 6  ;;  %v233_v42 = vrot.slane %v130_v15, 7  ;;  %v155_v43 = vmul.f32 0.6258357, %v1954_v1  ;;  %v268_v45 = vsel %vm267_vm12, %v266_v23, %v143_v20 }
  0x3a   :  { %v106_v4 = vadd.f32 %v105_v48, %v104_v47  ;;  %v192_v47 = vmul.f32 %v191_v37, %v137_v36  ;;  %v200_v48 = vmul.f32 0.0058489223, %v198_v21  ;;  %v139_v57 = vmul.f32 %v137_v36, %v135_v61 }
  0x3b   :  { %v181_v58 = vmul.f32 %v2044_v38, %v124_v14  ;;  %v209_v8 = vrot.slane %v1954_v1, 6  ;;  %v101_v54 = vmul.f32 %v1979_v27, %v1905_v28  ;;  %v102_v1 = vmul.f32 %v1981_v29, %v1915_v39 }
  0x3c   :  { %v228_v22 = vmul.f32 0.68318415, %v106_v4  ;;  %v290_v61 = vrot.slane %v192_v47, 1  ;;  %v202_v5 = vmul.f32 %v200_v48, %v152_v31  ;;  %v201_v31 = vmul.f32 %v200_v48, %v148_v41 }
  0x3d   :  { %v193_v15 = vmul.f32 %v191_v37, %v141_v0  ;;  %v220_v16 = vrot.slane %v1979_v27, 6  ;;  %v242_v0 = vrot.slane %v139_v57, 4  ;;  %v103_v20 = vsub.f32 %v101_v54, %v102_v1 }
  0x3e   :  { %v248_v44 = vrot.slane %v228_v22, 7 }
  0x3f   :  { %v257_v37 = vrot.slane %v193_v15, 5  ;;  %v227_v36 = vmul.f32 0.68318415, %v103_v20 }
  0x40   :  { %v279_v4 = vsel %vm265_vm8, %v155_v43, %v248_v44 }
  0x41   :  { %v299_v43 = vrot.slane %v227_v36, 3 }
  0x81   :  { %v336_v17 = vpop.permute.xlu1 %335  ;;  %v330_v19 = vpop.permute.xlu0 %329 }
  0x82   :  { %vm376_vm3 = vcmp.eq.s32.totalorder %v330_v19, %v1976_v25  ;;  %vm378_vm5 = vcmp.eq.s32.totalorder %v336_v17, %v1976_v25  ;;  %v216_v17 = vmul.f32 10395.0, %v1934_v52  ;;  %v2028_v19 = vmul.f32 0.8462844, %v114_v63 }
  0x83   :  { %v2065_v63 = vmul.f32 %v148_v41, %v1983_v30 }
  0x84   :  { %v2046_v40 = vmul.f32 0.00022766899, %v216_v17  ;;  %v236_v3 = vrot.slane %v2028_v19, 6  ;;  %v254_v17 = vrot.slane %v202_v5, 6  ;;  %v182_v19 = vmul.f32 %v2044_v38, %v128_v60 }
  0x85   :  { %v339_v33 = vpop.permute.xlu1 %338  ;;  %v333_v34 = vpop.permute.xlu0 %332 }
  0x86   :  { %vm377_vm2 = vcmp.eq.s32.totalorder %v333_v34, %v1976_v25  ;;  %vm379_vm6 = vcmp.eq.s32.totalorder %v339_v33, %v1976_v25  ;;  %v164_v33 = vadd.f32 6.5625, %v163_v12  ;;  %v207_v34 = vmul.f32 0.0010678623, %v206_v13 }
  0x87   :  { %vm1611_vm4 = vmpackc.low %vm377_vm2, %vm376_vm3  ;;  %v226_v62 = vmul.f32 %v224_v2, %v2046_v40  ;;  %v287_v13 = vrot.slane %v181_v58, 2  ;;  %v222_v23 = vmul.f32 %v220_v16, %v2046_v40 }
  0x88   :  { %1612 = vmatpush3.bf16.msk.msra.mxu0 %vm1611_vm4, %v1806_v51  ;;  %vm1614_vm7 = vmpackc.low %vm379_vm6, %vm378_vm5  ;;  %v165_v50 = vmul.f32 %v164_v33, %v1934_v52  ;;  %vm271_vm4 = vcmask 1043456   ;;  %v211_v28 = vmul.f32 %v209_v8, %v207_v34 }
  0x89   :  { %v345_v55 = vpop.permute.xlu1 %344  ;;  %v342_v56 = vpop.permute.xlu0 %341  ;;  %1613 = vmatprep.subr.bf16.mxu0 %v1803_v7  ;;  %v280_v12 = vsel %vm267_vm12, %v279_v4, %v226_v62  ;;  %v301_v21 = vsel %vm265_vm8, %v287_v13, %v290_v61  ;;  %v296_v40 = vrot.slane %v222_v23, 6  ;;  %v2139_v4 = vshrl.u32 %v308_v6, 7 }
  0x8a   :  { %vm381_vm9 = vcmp.eq.s32.totalorder %v345_v55, %v1976_v25  ;;  %vm380_vm10 = vcmp.eq.s32.totalorder %v342_v56, %v1976_v25  ;;  %v215_v55 = vmul.f32 %v213_v24, %v207_v34  ;;  %v126_v56 = vmul.f32 %v124_v14, %v2008_v59 }
  0x8b   :  { %vm1617_vm11 = vmpackc.low %vm381_vm9, %vm380_vm10  ;;  %v270_v59 = vsel %vm269_vm1, %v268_v45, %v233_v42  ;;  %vm273_vm10 = vcmask 1044480   ;;  %v245_v24 = vrot.slane %v2065_v63, 3  ;;  %v260_v34 = vrot.slane %v182_v19, 4  ;;  %v528_v45 = vld [vmem:[%s2424_s2] sm:$0xff] }
  0x8c   :  { %1615 = vmatpush3.bf16.msk.msra.mxu0 %vm1614_vm7, %v1806_v51  ;;  %v239_v14 = vrot.slane %v126_v56, 5  ;;  %v426_v56 = vld [vmem:[#allocation2 + $0x10] sm:$0x7f]  ;;  %v2148_v8 = vsub.s32 0, %v2139_v4  ;;  %v2160_v6 = vsub.s32 4, %v2139_v4  ;;  %v592_v13 = vsub.s32 7, %v2139_v4 }
  0x8d   :  { %v351_v10 = vpop.permute.xlu1 %350  ;;  %v348_v11 = vpop.permute.xlu0 %347  ;;  %1616 = vmatprep.subr.bf16.mxu0 %v1803_v7 }
  0x8e   :  { %vm383_vm13 = vcmp.eq.s32.totalorder %v351_v10, %v1976_v25  ;;  %vm382_vm14 = vcmp.eq.s32.totalorder %v348_v11, %v1976_v25  ;;  %v167_v10 = vmul.f32 %v165_v50, %v1934_v52  ;;  %v251_v11 = vrot.slane %v215_v55, 7 }
  0x8f   :  { %vm1620_vm15 = vmpackc.low %vm383_vm13, %vm382_vm14  ;;  %v272_v52 = vsel %vm271_vm4, %v270_v59, %v236_v3  ;;  %vm275_vm14 = vcmask 1045504   ;;  %v2142_v59 = vsub.s32 6, %v2139_v4 }
  0x90   :  { %1618 = vmatpush3.bf16.msk.msra.mxu0 %vm1617_vm11, %v1806_v51  ;;  %v168_v39 = vadd.f32 -0.3125, %v167_v10  ;;  %v281_v46 = vsel %vm269_vm1, %v280_v12, %v251_v11  ;;  %v274_v22 = vsel %vm273_vm10, %v272_v52, %v239_v14  ;;  %v2157_v10 = vsub.s32 3, %v2139_v4 }
  0x91   :  { %v357_v26 = vpop.permute.xlu1 %356  ;;  %v354_v32 = vpop.permute.xlu0 %353  ;;  %1619 = vmatprep.subr.bf16.mxu0 %v1803_v7  ;;  %v282_v35 = vsel %vm271_vm4, %v281_v46, %v254_v17  ;;  %v276_v33 = vsel %vm275_vm14, %v274_v22, %v242_v0  ;;  %v2163_v11 = vsub.s32 5, %v2139_v4 }
  0x92   :  { %vm385_vm2 = vcmp.eq.s32.totalorder %v357_v26, %v1976_v25  ;;  %vm384_vm3 = vcmp.eq.s32.totalorder %v354_v32, %v1976_v25  ;;  %v293_v26 = vrot.slane %v211_v28, 7  ;;  %v169_v60 = vmul.f32 1.0171072, %v168_v39 }
  0x93   :  { %vm1623_vm5 = vmpackc.low %vm385_vm2, %vm384_vm3  ;;  %v302_v32 = vsel %vm267_vm12, %v301_v21, %v201_v31  ;;  %v283_v38 = vsel %vm273_vm10, %v282_v35, %v257_v37 }
  0x94   :  { %1621 = vmatpush3.bf16.msk.msra.mxu0 %vm1620_vm15, %v1806_v51  ;;  %v303_v2 = vsel %vm269_vm1, %v302_v32, %v293_v26  ;;  %v263_v41 = vrot.slane %v169_v60, 3  ;;  %v284_v42 = vsel %vm275_vm14, %v283_v38, %v260_v34 }
  0x95   :  { %v363_v53 = vpop.permute.xlu1 %362  ;;  %v360_v49 = vpop.permute.xlu0 %359  ;;  %1622 = vmatprep.subr.bf16.mxu0 %v1803_v7  ;;  %v304_v44 = vsel %vm271_vm4, %v303_v2, %v296_v40 }
  0x96   :  { %vm387_vm6 = vcmp.eq.s32.totalorder %v363_v53, %v1976_v25  ;;  %vm386_vm7 = vcmp.eq.s32.totalorder %v360_v49, %v1976_v25  ;;  %v305_v48 = vsel %vm273_vm10, %v304_v44, %v299_v43 }
  0x97   :  { %vm1626_vm9 = vmpackc.low %vm387_vm6, %vm386_vm7  ;;  %vm658_vm7 = vcmask 662528  }
  0x98   :  { %1624 = vmatpush3.bf16.msk.msra.mxu0 %vm1623_vm5, %v1806_v51  ;;  %vm277_vm5 = vcmask 1046528   ;;  %1574 = vmatprep.mubr.msk.f32.mxu1 %vm658_vm7, %v528_v45 }
  0x99   :  { %v369_v30 = vpop.permute.xlu1 %368  ;;  %v366_v9 = vpop.permute.xlu0 %365  ;;  %1625 = vmatprep.subr.bf16.mxu0 %v1803_v7  ;;  %v285_v47 = vsel %vm277_vm5, %v284_v42, %v263_v41 }
  0x9a   :  { %vm389_vm11 = vcmp.eq.s32.totalorder %v369_v30, %v1976_v25  ;;  %vm388_vm13 = vcmp.eq.s32.totalorder %v366_v9, %v1976_v25  ;;  %v2151_v30 = vsub.s32 1, %v2139_v4  ;;  %v2154_v9 = vsub.s32 2, %v2139_v4 }
  0x9b   :  { %vm1629_vm15 = vmpackc.low %vm389_vm11, %vm388_vm13  ;;  %vm1807_vm11 = vmmov 1  }
  0x9c   :  { %1627 = vmatpush3.bf16.msk.msra.mxu0 %vm1626_vm9, %v1806_v51  ;;  %vm968_vm9 = vcmask 334848   ;;  %vm1686_vm13 = vmpackc.low %vm265_vm8, %vm1807_vm11 }
  0x9d   :  { %v375_v27 = vpop.permute.xlu1 %374  ;;  %v372_v29 = vpop.permute.xlu0 %371  ;;  %1628 = vmatprep.subr.bf16.mxu0 %v1803_v7 }
  0x9e   :  { %vm391_vm2 = vcmp.eq.s32.totalorder %v375_v27, %v1976_v25  ;;  %vm390_vm3 = vcmp.eq.s32.totalorder %v372_v29, %v1976_v25  ;;  %v278_v25 = vsel %vm277_vm5, %v276_v33, %v245_v24 }
  0x9f   :  { %vm1632_vm6 = vmpackc.low %vm391_vm2, %vm390_vm3 }
  0xa0   :  { %1630 = vmatpush3.bf16.msk.msra.mxu0 %vm1629_vm15, %v1806_v51 }
  0xa1   :  { %1631 = vmatprep.subr.bf16.mxu0 %v1803_v7 }
  0xa4   :  { %1633 = vmatpush3.bf16.msk.msra.mxu0 %vm1632_vm6, %v1806_v51  ;;  %v306_v51 = vsel %vm275_vm14, %v305_v48, 1.0 }
  0xa7   :  { %1544 = vmatmul.mubr.f32.vlgmr.msra.gmra.mrb[0].mxu0 %v278_v25 }
  0xa8   :  { %1546 = vmatprep.mubr.msk.f32.mxu0 %vm1804_vm0, %v1805_v18 }
  0xab   :  { %1547 = vmatmul.mubr.f32.gmra.mrb[2].mxu0 %v285_v47 }
  0xac   :  { %1549 = vmatprep.mubr.msk.f32.mxu0 %vm1804_vm0, %v1805_v18 }
  0xaf   :  { %1550 = vmatmul.mubr.f32.gmra.mrb[4].mxu0 %v306_v51 }
 0x17a   :  { %v493_v53 = vpop.f32.mrb[0].mxu0 }
 0x17b   :  { %v1545_v49 = vpop.f32.mrb[1].mxu0 }
 0x17e   :  { %v498_v50 = vpop.f32.mrb[2].mxu0 }
 0x17f   :  { %v1548_v55 = vpop.f32.mrb[3].mxu0 }
 0x182   :  { %v503_v57 = vpop.f32.mrb[4].mxu0 }
 0x183   :  { %v509_v58 = vadd.f32 %v503_v57, %v426_v56  ;;  %v1551_v62 = vpop.f32.mrb[5].mxu0 }
 0x185   :  { %512 = vst [vmem:[#allocation2 + $0x10] sm:$0x7f] %v509_v58 }
 0x18c   :  { %v2135_v63 = vld [vmem:[#allocation2 + $0x10] sm:$0x7f] }
 0x18d   :  { %v519_v3 = vmax.f32 %v2135_v63, 1.0 }
 0x18f   :  { %1712 = vrcp.f32 %v519_v3 }
 0x199   :  { %v1713_v61 = vpop.eup %1712 }
 0x19a   :  { %v2145_v5 = vrot.slane %v1713_v61, %v2142_v59 }
 0x19c   :  { %v2166_v12 = vmul.f32 %v2145_v5, %v493_v53  ;;  %v2170_v54 = vmul.f32 %v2145_v5, %v498_v50 }
 0x19e   :  { %v551_v1 = vrot.slane %v2166_v12, %v2148_v8  ;;  %v557_v31 = vrot.slane %v2166_v12, %v2151_v30  ;;  %v563_v14 = vrot.slane %v2166_v12, %v2154_v9  ;;  %v569_v15 = vrot.slane %v2166_v12, %v2157_v10 }
 0x19f   :  { %v575_v16 = vrot.slane %v2166_v12, %v2160_v6  ;;  %v581_v52 = vrot.slane %v2166_v12, %v2163_v11  ;;  %v587_v17 = vrot.slane %v2166_v12, %v2142_v59  ;;  %v593_v50 = vrot.slane %v2166_v12, %v592_v13 }
 0x1a0   :  { %v552_v28 = vmul.f32 %v551_v1, %v2166_v12  ;;  %v553_v39 = vmul.f32 %v551_v1, %v2170_v54  ;;  %v558_v46 = vmul.f32 %v557_v31, %v2166_v12  ;;  %v559_v27 = vmul.f32 %v557_v31, %v2170_v54 }
 0x1a1   :  { %v564_v29 = vmul.f32 %v563_v14, %v2166_v12  ;;  %v565_v0 = vmul.f32 %v563_v14, %v2170_v54  ;;  %v570_v19 = vmul.f32 %v569_v15, %v2166_v12  ;;  %v571_v20 = vmul.f32 %v569_v15, %v2170_v54 }
 0x1a2   :  { %v604_v21 = vrot.slane %v558_v46, 7  ;;  %v605_v22 = vrot.slane %v559_v27, 7  ;;  %v576_v37 = vmul.f32 %v575_v16, %v2166_v12  ;;  %v577_v23 = vmul.f32 %v575_v16, %v2170_v54 }
 0x1a3   :  { %v611_v24 = vrot.slane %v564_v29, 6  ;;  %v612_v35 = vrot.slane %v565_v0, 6  ;;  %v618_v26 = vrot.slane %v570_v19, 5  ;;  %v582_v60 = vmul.f32 %v581_v52, %v2166_v12 }
 0x1a4   :  { %v651_v32 = vsel %vm265_vm8, %v553_v39, %v604_v21  ;;  %v606_v33 = vsel %vm265_vm8, %v604_v21, %v605_v22  ;;  %v619_v34 = vrot.slane %v571_v20, 5  ;;  %v625_v36 = vrot.slane %v576_v37, 4 }
 0x1a5   :  { %v1634_v38 = vpack.c.bf16 %v651_v32, %v552_v28  ;;  %v613_v40 = vsel %vm267_vm12, %v611_v24, %v612_v35  ;;  %v652_v2 = vsel %vm267_vm12, %v606_v33, %v611_v24  ;;  %v626_v25 = vrot.slane %v577_v23, 4 }
 0x1a6   :  { %v653_v41 = vsel %vm269_vm1, %v613_v40, %v618_v26  ;;  %v620_v42 = vsel %vm269_vm1, %v618_v26, %v619_v34  ;;  %v632_v43 = vrot.slane %v582_v60, 3  ;;  %v583_v44 = vmul.f32 %v581_v52, %v2170_v54 }
 0x1a7   :  { %1635 = vmatprep.subr.bf16.mxu1 %v1634_v38  ;;  %v1638_v47 = vpack.c.bf16 %v653_v41, %v652_v2  ;;  %v627_v48 = vsel %vm271_vm4, %v625_v36, %v626_v25  ;;  %v654_v51 = vsel %vm271_vm4, %v620_v42, %v625_v36  ;;  %v588_v45 = vmul.f32 %v587_v17, %v2166_v12  ;;  %v529_v25 = vld [vmem:[%s2424_s2 + $0x8] sm:$0x1] }
 0x1a8   :  { %1637 = vmatpush3.bf16.msra.mxu1 %v1634_v38  ;;  %v655_v53 = vsel %vm273_vm10, %v627_v48, %v632_v43  ;;  %v589_v49 = vmul.f32 %v587_v17, %v2170_v54  ;;  %v633_v55 = vrot.slane %v583_v44, 3  ;;  %v594_v57 = vmul.f32 %v593_v50, %v2166_v12  ;;  %v762_v42 = vld [vmem:[%s2425_s3 + $0x8] sm:$0xff] }
 0x1a9   :  { %1639 = vmatprep.subr.bf16.mxu1 %v1638_v47  ;;  %v639_v56 = vrot.slane %v588_v45, 2  ;;  %v595_v3 = vmul.f32 %v593_v50, %v2170_v54  ;;  %v1642_v61 = vpack.c.bf16 %v655_v53, %v654_v51  ;;  %v792_v1 = vrot.slane %v2170_v54, %v2151_v30 }
 0x1aa   :  { %v634_v58 = vsel %vm273_vm10, %v632_v43, %v633_v55  ;;  %v640_v62 = vrot.slane %v589_v49, 2  ;;  %v646_v14 = vrot.slane %v594_v57, 1  ;;  %v599_v52 = vrot.slane %v2170_v54, %v2148_v8 }
 0x1ab   :  { %v656_v15 = vsel %vm275_vm14, %v634_v58, %v639_v56  ;;  %v647_v16 = vrot.slane %v595_v3, 1  ;;  %v798_v17 = vrot.slane %v2170_v54, %v2154_v9  ;;  %v2225_v28 = vmul.f32 %v2145_v5, %v2135_v63 }
 0x1ac   :  { %1641 = vmatpush3.bf16.msra.mxu1 %v1638_v47  ;;  %v641_v31 = vsel %vm275_vm14, %v639_v56, %v640_v62  ;;  %v793_v29 = vmul.f32 %v792_v1, %v2170_v54  ;;  %v600_v19 = vmul.f32 %v599_v52, %v2166_v12  ;;  %v804_v21 = vrot.slane %v2170_v54, %v2157_v10 }
 0x1ad   :  { %1643 = vmatprep.subr.bf16.mxu1 %v1642_v61  ;;  %v657_v39 = vsel %vm277_vm5, %v641_v31, %v646_v14  ;;  %v648_v27 = vsel %vm277_vm5, %v646_v14, %v647_v16  ;;  %v794_v0 = vmul.f32 %v792_v1, %v2225_v28  ;;  %v799_v20 = vmul.f32 %v798_v17, %v2170_v54 }
 0x1ae   :  { %v1646_v46 = vpack.c.bf16 %v657_v39, %v656_v15  ;;  %v1650_v63 = vpack.c.bf16 %v600_v19, %v648_v27  ;;  %v869_v5 = vrot.slane %v793_v29, 1  ;;  %v810_v37 = vrot.slane %v2170_v54, %v2160_v6 }
 0x1af   :  { %v870_v22 = vrot.slane %v794_v0, 1  ;;  %v876_v23 = vrot.slane %v799_v20, 4  ;;  %v800_v24 = vmul.f32 %v798_v17, %v2225_v28  ;;  %v805_v35 = vmul.f32 %v804_v21, %v2170_v54 }
 0x1b0   :  { %1645 = vmatpush3.bf16.msra.mxu1 %v1642_v61  ;;  %v806_v26 = vmul.f32 %v804_v21, %v2225_v28  ;;  %v601_v60 = vmul.f32 %v599_v52, %v2170_v54  ;;  %v811_v33 = vmul.f32 %v810_v37, %v2170_v54  ;;  %v816_v34 = vrot.slane %v2170_v54, %v2163_v11 }
 0x1b1   :  { %1647 = vmatprep.subr.bf16.mxu1 %v1646_v46  ;;  %v871_v32 = vsel %vm277_vm5, %v869_v5, %v870_v22  ;;  %v957_v36 = vsel %vm273_vm10, %v870_v22, %v876_v23  ;;  %v877_v38 = vrot.slane %v800_v24, 4  ;;  %v884_v40 = vrot.slane %v805_v35, 7 }
 0x1b2   :  { %v812_v2 = vmul.f32 %v810_v37, %v2225_v28  ;;  %v885_v41 = vrot.slane %v806_v26, 7  ;;  %v1655_v43 = vpack.c.bf16 %v957_v36, %v871_v32  ;;  %v891_v44 = vrot.slane %v811_v33, 2 }
 0x1b3   :  { %v817_v47 = vmul.f32 %v816_v34, %v2170_v54  ;;  %v818_v48 = vmul.f32 %v816_v34, %v2225_v28  ;;  %v878_v51 = vsel %vm271_vm4, %v876_v23, %v877_v38  ;;  %v958_v45 = vsel %vm267_vm12, %v877_v38, %v884_v40 }
 0x1b4   :  { %1649 = vmatpush3.bf16.msra.mxu1 %v1646_v46  ;;  %v892_v53 = vrot.slane %v812_v2, 2  ;;  %v828_v49 = vrot.slane %v2170_v54, %v592_v13  ;;  %v886_v50 = vsel %vm265_vm8, %v884_v40, %v885_v41  ;;  %v834_v55 = vrot.slane %v2225_v28, %v2148_v8 }
 0x1b5   :  { %1651 = vmatprep.subr.bf16.mxu1 %v1650_v63  ;;  %v1658_v56 = vpack.c.bf16 %v958_v45, %v878_v51  ;;  %v899_v57 = vrot.slane %v817_v47, 5  ;;  %v959_v62 = vsel %vm277_vm5, %v886_v50, %v891_v44  ;;  %v900_v3 = vrot.slane %v818_v48, 5 }
 0x1b6   :  { %v893_v58 = vsel %vm275_vm14, %v891_v44, %v892_v53  ;;  %v829_v4 = vmul.f32 %v828_v49, %v2170_v54  ;;  %v822_v13 = vrot.slane %v2170_v54, %v2142_v59  ;;  %v840_v8 = vrot.slane %v2225_v28, %v2151_v30 }
 0x1b7   :  { %v1661_v61 = vpack.c.bf16 %v893_v58, %v959_v62  ;;  %v960_v1 = vsel %vm271_vm4, %v892_v53, %v899_v57  ;;  %v901_v31 = vsel %vm269_vm1, %v899_v57, %v900_v3  ;;  %v830_v15 = vmul.f32 %v828_v49, %v2225_v28 }
 0x1b8   :  { %1653 = vmatpush3.bf16.msra.mxu1 %v1650_v63  ;;  %v907_v14 = vrot.slane %v829_v4, 3  ;;  %v835_v16 = vmul.f32 %v834_v55, %v2170_v54  ;;  %v823_v52 = vmul.f32 %v822_v13, %v2170_v54  ;;  %v824_v59 = vmul.f32 %v822_v13, %v2225_v28 }
 0x1b9   :  { %1572 = vmatprep.subr.msk.mxu1 %vm265_vm8, %v601_v60  ;;  %v836_v17 = vmul.f32 %v834_v55, %v2225_v28  ;;  %v1664_v39 = vpack.c.bf16 %v901_v31, %v960_v1  ;;  %v841_v46 = vmul.f32 %v840_v8, %v2170_v54  ;;  %v842_v30 = vmul.f32 %v840_v8, %v2225_v28  ;;  %v764_v1 = vld [vmem:[%s2425_s3 + $0x18] sm:$0x1f]  ;;  %v763_v8 = vld [vmem:[%s2425_s3 + $0x10] sm:$0x1f]  ;;  %v1086_v31 = vld [vmem:[%s2426_s4] sm:$0xff] }
 0x1ba   :  { %v846_v27 = vrot.slane %v2225_v28, %v2154_v9  ;;  %v961_v29 = vsel %vm265_vm8, %v900_v3, %v823_v52  ;;  %v962_v0 = vsel %vm275_vm14, %v824_v59, %v907_v14  ;;  %v908_v19 = vrot.slane %v830_v15, 3 }
 0x1bb   :  { %v915_v20 = vrot.slane %v835_v16, 6  ;;  %v852_v21 = vrot.slane %v2225_v28, %v2157_v10  ;;  %v916_v63 = vrot.slane %v836_v17, 6  ;;  %v1667_v5 = vpack.c.bf16 %v962_v0, %v961_v29 }
 0x1bc   :  { %1573 = vmatpush3.msk.msra.mxu1 %vm265_vm8, %v601_v60  ;;  %v922_v22 = vrot.slane %v841_v46, 1  ;;  %v923_v37 = vrot.slane %v842_v30, 1  ;;  %v847_v23 = vmul.f32 %v846_v27, %v2170_v54  ;;  %v909_v9 = vsel %vm273_vm10, %v907_v14, %v908_v19 }
 0x1bd   :  { %1575 = vmatmul.mubr.msk.f32.vlgmr.msra.gmra.mrb[0].mxu1 %vm658_vm7, %v529_v25  ;;  %1654 = vmatprep.subr.bf16.mxu1 %v1803_v7  ;;  %v963_v24 = vsel %vm269_vm1, %v908_v19, %v915_v20  ;;  %v848_v35 = vmul.f32 %v846_v27, %v2225_v28  ;;  %v858_v26 = vrot.slane %v2225_v28, %v2160_v6 }
 0x1be   :  { %1656 = vmatpush1.bf16.msra.mxu1 %v1655_v43  ;;  %1441 = vmatprep.mubr.msk.f32.mxu1 %vm968_vm9, %v762_v42  ;;  %v853_v10 = vmul.f32 %v852_v21, %v2170_v54  ;;  %v854_v60 = vmul.f32 %v852_v21, %v2225_v28  ;;  %v1670_v32 = vpack.c.bf16 %v963_v24, %v909_v9  ;;  %v929_v34 = vrot.slane %v847_v23, 4 }
 0x1bf   :  { %1657 = vmatprep.subr.bf16.mxu1 %v1803_v7  ;;  %v917_v33 = vsel %vm267_vm12, %v915_v20, %v916_v63  ;;  %v924_v36 = vsel %vm277_vm5, %v922_v22, %v923_v37  ;;  %v930_v38 = vrot.slane %v848_v35, 4  ;;  %v859_v40 = vmul.f32 %v858_v26, %v2170_v54 }
 0x1c0   :  { %v864_v2 = vrot.slane %v2225_v28, %v2163_v11  ;;  %v937_v6 = vrot.slane %v853_v10, 7  ;;  %v938_v25 = vrot.slane %v854_v60, 7  ;;  %v1673_v41 = vpack.c.bf16 %v924_v36, %v917_v33 }
 0x1c1   :  { %v964_v42 = vsel %vm273_vm10, %v923_v37, %v929_v34  ;;  %v931_v43 = vsel %vm271_vm4, %v929_v34, %v930_v38  ;;  %v944_v44 = vrot.slane %v859_v40, 2  ;;  %v860_v47 = vmul.f32 %v858_v26, %v2225_v28 }
 0x1c2   :  { %1659 = vmatpush1.bf16.msra.mxu1 %v1658_v56  ;;  %v865_v48 = vmul.f32 %v864_v2, %v2170_v54  ;;  %v939_v51 = vsel %vm265_vm8, %v937_v6, %v938_v25  ;;  %v1676_v11 = vpack.c.bf16 %v931_v43, %v964_v42  ;;  %v965_v45 = vsel %vm267_vm12, %v930_v38, %v937_v6 }
 0x1c3   :  { %1660 = vmatprep.subr.bf16.mxu1 %v1803_v7  ;;  %v966_v53 = vsel %vm277_vm5, %v939_v51, %v944_v44  ;;  %v945_v49 = vrot.slane %v860_v47, 2  ;;  %v866_v55 = vmul.f32 %v864_v2, %v2225_v28  ;;  %v765_v46 = vmul.f32 %v2225_v28, %v2225_v28 }
 0x1c4   :  { %v952_v50 = vrot.slane %v865_v48, 5  ;;  %v1679_v56 = vpack.c.bf16 %v966_v53, %v965_v45  ;;  %v530_v29 = vmul.f32 %v2166_v12, %v2166_v12 }
 0x1c5   :  { %v946_v57 = vsel %vm275_vm14, %v944_v44, %v945_v49  ;;  %v953_v62 = vrot.slane %v866_v55, 5  ;;  %vm1094_vm14 = vcmask 31744   ;;  %v769_v27 = vrot.slane %v765_v46, 1 }
 0x1c6   :  { %1662 = vmatpush1.bf16.msra.mxu1 %v1661_v61  ;;  %v967_v58 = vsel %vm271_vm4, %v945_v49, %v952_v50  ;;  %v761_v61 = vld [vmem:[%s2425_s3] sm:$0xff]  ;;  %1579 = vmatprep.mubr.msk.f32.mxu0 %vm1094_vm14, %v1086_v31 }
 0x1c7   :  { %1663 = vmatprep.subr.bf16.mxu1 %v1803_v7  ;;  %v1682_v3 = vpack.c.bf16 %v967_v58, %v946_v57  ;;  %v954_v4 = vsel %vm269_vm1, %v952_v50, %v953_v62  ;;  %v773_v20 = vsel %vm273_vm10, %v769_v27, 0.0 }
 0x1c8   :  { %v1685_v13 = vpack.c.bf16 %v953_v62, %v954_v4 }
 0x1ca   :  { %1665 = vmatpush1.bf16.msra.mxu1 %v1664_v39  ;;  %v531_v39 = vmul.f32 %v2170_v54, %v2170_v54 }
 0x1cb   :  { %1666 = vmatprep.subr.bf16.mxu1 %v1803_v7 }
 0x1cc   :  { %v768_v30 = vrot.slane %v531_v39, 1  ;;  %v532_v0 = vsel %vm265_vm8, %v531_v39, 0.0 }
 0x1cd   :  { %v533_v21 = vadd.f32 %v532_v0, %v530_v29 }
 0x1ce   :  { %1668 = vmatpush1.bf16.msra.mxu1 %v1667_v5  ;;  %v770_v19 = vsel %vm277_vm5, %v768_v30, %v769_v27 }
 0x1cf   :  { %1669 = vmatprep.subr.bf16.mxu1 %v1803_v7  ;;  %v774_v63 = vadd.f32 %v773_v20, %v770_v19  ;;  %v534_v5 = vrot.slane %v533_v21, 4 }
 0x1d1   :  { %v775_v22 = vrot.slane %v774_v63, 4  ;;  %v535_v37 = vadd.f32 %v534_v5, %v533_v21 }
 0x1d2   :  { %1671 = vmatpush1.bf16.msra.mxu1 %v1670_v32 }
 0x1d3   :  { %1672 = vmatprep.subr.bf16.mxu1 %v1803_v7  ;;  %v776_v23 = vadd.f32 %v775_v22, %v774_v63  ;;  %v536_v9 = vrot.slane %v535_v37, 2 }
 0x1d5   :  { %v777_v24 = vrot.slane %v776_v23, 2  ;;  %v537_v35 = vadd.f32 %v536_v9, %v535_v37  ;;  %v1088_v9 = vld [vmem:[%s2426_s4 + $0x10] sm:$0xff] }
 0x1d6   :  { %1674 = vmatpush1.bf16.msra.mxu1 %v1673_v41 }
 0x1d7   :  { %1675 = vmatprep.subr.bf16.mxu1 %v1803_v7  ;;  %v778_v26 = vadd.f32 %v777_v24, %v776_v23  ;;  %v538_v10 = vrot.slane %v537_v35, 1  ;;  %v1087_v23 = vld [vmem:[%s2426_s4 + $0x8] sm:$0xff]  ;;  %v1089_v24 = vld [vmem:[%s2426_s4 + $0x18] sm:$0xff] }
 0x1d9   :  { %v779_v60 = vrot.slane %v778_v26, 1  ;;  %v539_v32 = vadd.f32 %v538_v10, %v537_v35  ;;  %v1090_v35 = vld [vmem:[%s2426_s4 + $0x20] sm:$0xff]  ;;  %v1092_v10 = vld [vmem:[%s2426_s4 + $0x30] sm:$0xff] }
 0x1da   :  { %1677 = vmatpush1.bf16.msra.mxu1 %v1676_v11 }
 0x1db   :  { %1678 = vmatprep.subr.bf16.mxu1 %v1803_v7  ;;  %v753_v34 = vmax.f32 %v539_v32, 1e-20  ;;  %v540_v25 = vmul.f32 1.3962634, %v539_v32  ;;  %vm755_vm2 = vcmp.gt.f32.partialorder %v539_v32, 0.0 }
 0x1dd   :  { %1714 = vrsqrt.f32 %v753_v34  ;;  %v546_v30 = vand.u32 2147483648, %v540_v25 }
 0x1de   :  { %1680 = vmatpush1.bf16.msra.mxu1 %v1679_v56 }
 0x1df   :  { %1681 = vmatprep.subr.bf16.mxu1 %v1803_v7 }
 0x1e2   :  { %1683 = vmatpush1.bf16.msra.mxu1 %v1682_v3 }
 0x1e3   :  { %1684 = vmatprep.subr.bf16.mxu1 %v1803_v7 }
 0x1e6   :  { %1687 = vmatpush1.bf16.msk.msra.mxu1 %vm1686_vm13, %v1685_v13 }
 0x1e7   :  { %v1715_v56 = vpop.eup %1714 }
 0x1e8   :  { %v756_v4 = vmul.f32 %v1715_v56, %v1715_v56 }
 0x1e9   :  { %1042 = vmatmul.mubr.f32.vlgmr.msra.gmra.mrb[2].mxu1 %v761_v61 }
 0x1ea   :  { %1442 = vmatprep.mubr.msk.f32.mxu1 %vm968_vm9, %v764_v1 }
 0x1ed   :  { %1047 = vmatmul.mubr.f32.gmra.mrb[4].mxu1 %v763_v8 }
 0x290   :  { %v1576_v14 = vpop.f32.mrb[0].mxu1 }
 0x291   :  { %v744_v15 = vmul.f32 %v1576_v14, %v2170_v54  ;;  %v734_v16 = vpop.f32.mrb[1].mxu1  ;;  %v757_v14 = vmul.f32 %v1715_v56, %v756_v4 }
 0x292   :  { %v743_v52 = vmul.f32 %v734_v16, %v2166_v12  ;;  %v780_v12 = vadd.f32 %v779_v60, %v778_v26  ;;  %v1091_v26 = vld [vmem:[%s2426_s4 + $0x28] sm:$0xff]  ;;  %v1093_v60 = vld [vmem:[%s2426_s4 + $0x38] sm:$0xff] }
 0x293   :  { %v745_v59 = vsel %vm265_vm8, %v744_v15, 0.0 }
 0x294   :  { %v746_v17 = vadd.f32 %v745_v59, %v743_v52  ;;  %v781_v40 = vmul.f32 0.96664387, %v780_v12  ;;  %v1076_v42 = vmax.f32 %v780_v12, 1e-20  ;;  %vm1078_vm6 = vcmp.gt.f32.partialorder %v780_v12, 0.0 }
 0x296   :  { %v747_v33 = vrot.slane %v746_v17, 4  ;;  %1716 = vrsqrt.f32 %v781_v40  ;;  %vm784_vm15 = vcmp.eq.f32.partialorder %v781_v40, inf  ;;  %vm786_vm3 = vcmp.eq.f32.partialorder %v781_v40, 0.0 }
 0x297   :  { %1718 = vrsqrt.f32 %v540_v25 }
 0x298   :  { %v748_v2 = vadd.f32 %v747_v33, %v746_v17  ;;  %1720 = vrsqrt.f32 %v1076_v42  ;;  %v787_v17 = vand.u32 2147483648, %v781_v40 }
 0x29a   :  { %v749_v47 = vrot.slane %v748_v2, 2 }
 0x29c   :  { %v750_v45 = vadd.f32 %v749_v47, %v748_v2 }
 0x29e   :  { %v751_v58 = vrot.slane %v750_v45, 1 }
 0x2a0   :  { %v1717_v62 = vpop.eup %1716  ;;  %v752_v1 = vadd.f32 %v751_v58, %v750_v45 }
 0x2a1   :  { %v783_v8 = vmul.f32 %v1717_v62, %v781_v40 }
 0x2a2   :  { %v758_v52 = vmul.f32 %v757_v14, %v752_v1 }
 0x2a3   :  { %v785_v59 = vsel %vm784_vm15, %v781_v40, %v783_v8 }
 0x2a4   :  { %v788_v27 = vsel %vm786_vm3, %v787_v17, %v785_v59  ;;  %v759_v19 = vsel %vm755_vm2, %v758_v52, 0.0 }
 0x2bc   :  { %v1043_v36 = vpop.f32.mrb[2].mxu1 }
 0x2bd   :  { %v1045_v38 = vpop.f32.mrb[3].mxu1  ;;  %v1054_v6 = vrot.slane %v1043_v36, 7 }
 0x2bf   :  { %v1059_v48 = vmul.f32 %v1054_v6, %v2170_v54  ;;  %v1719_v54 = vpop.eup %1718 }
 0x2c0   :  { %v1048_v41 = vpop.f32.mrb[4].mxu1  ;;  %v1721_v61 = vpop.eup %1720  ;;  %v542_v31 = vmul.f32 %v1719_v54, %v540_v25 }
 0x2c1   :  { %v1055_v43 = vrot.slane %v1048_v41, 7  ;;  %v1050_v44 = vpop.f32.mrb[5].mxu1  ;;  %v1063_v53 = vrot.slane %v1059_v48, 1  ;;  %v1079_v16 = vmul.f32 %v1721_v61, %v1721_v61 }
 0x2c3   :  { %v1056_v51 = vsel %vm265_vm8, %v1054_v6, %v1055_v43  ;;  %v1080_v0 = vmul.f32 %v1721_v61, %v1079_v16 }
 0x2c4   :  { %v1060_v11 = vmul.f32 %v1056_v51, %v2225_v28 }
 0x2c6   :  { %v1064_v49 = vrot.slane %v1060_v11, 1 }
 0x2c8   :  { %v1065_v50 = vsel %vm277_vm5, %v1063_v53, %v1064_v49  ;;  %v1068_v55 = vsel %vm273_vm10, %v1064_v49, 0.0  ;;  %vm543_vm10 = vcmp.eq.f32.partialorder %v540_v25, inf  ;;  %vm545_vm5 = vcmp.eq.f32.partialorder %v540_v25, 0.0 }
 0x2c9   :  { %v1069_v57 = vadd.f32 %v1068_v55, %v1065_v50  ;;  %v544_v46 = vsel %vm543_vm10, %v540_v25, %v542_v31 }
 0x2ca   :  { %v547_v20 = vsel %vm545_vm5, %v546_v30, %v544_v46 }
 0x2cb   :  { %v1070_v3 = vrot.slane %v1069_v57, 4  ;;  %v1083_v63 = vsel %vm265_vm8, %v547_v20, %v788_v27 }
 0x2cc   :  { %v1084_v22 = vsel %vm267_vm12, %v1083_v63, %v759_v19 }
 0x2cd   :  { %v1071_v13 = vadd.f32 %v1070_v3, %v1069_v57 }
 0x2cf   :  { %v1072_v28 = vrot.slane %v1071_v13, 2 }
 0x2d1   :  { %v1073_v15 = vadd.f32 %v1072_v28, %v1071_v13 }
 0x2d3   :  { %v1074_v39 = vrot.slane %v1073_v15, 1 }
 0x2d5   :  { %v1075_v29 = vadd.f32 %v1074_v39, %v1073_v15 }
 0x2d7   :  { %v1081_v21 = vmul.f32 %v1080_v0, %v1075_v29 }
 0x2d9   :  { %v1082_v5 = vsel %vm1078_vm6, %v1081_v21, 0.0 }
 0x2da   :  { %v1085_v37 = vsel %vm269_vm1, %v1084_v22, %v1082_v5 }
 0x2db   :  { %1577 = vmatprep.subr.msk.mxu0 %vm271_vm4, %v1085_v37  ;;  %1376 = vst [vmem:[#allocation5] sm:$0xf] %v1085_v37 }
 0x2dc   :  { %1578 = vmatpush3.msk.msra.mxu0 %vm271_vm4, %v1085_v37 }
 0x2dd   :  { %1580 = vmatmul.mubr.msk.f32.vlgmr.msra.gmra.mrb[6].mxu0 %vm1094_vm14, %v1087_v23  ;;  %1688 = vmatprep.subr.bf16.mxu0 %v1803_v7 }
 0x2de   :  { %1582 = vmatprep.mubr.msk.f32.mxu0 %vm1094_vm14, %v1088_v9 }
 0x2e1   :  { %1583 = vmatmul.mubr.msk.f32.gmra.mrb[8].mxu0 %vm1094_vm14, %v1089_v24 }
 0x2e2   :  { %1585 = vmatprep.mubr.msk.f32.mxu0 %vm1094_vm14, %v1090_v35 }
 0x2e5   :  { %1586 = vmatmul.mubr.msk.f32.gmra.mrb[10].mxu0 %vm1094_vm14, %v1091_v26 }
 0x2e6   :  { %1588 = vmatprep.mubr.msk.f32.mxu0 %vm1094_vm14, %v1092_v10 }
 0x2e9   :  { %1589 = vmatmul.mubr.msk.f32.gmra.mrb[12].mxu0 %vm1094_vm14, %v1093_v60 }
 0x2ea   :  { %1607 = vmatprep.mubr.msk.f32.mxu0 %vm1804_vm0, %v1805_v18  ;;  %vm1300_vm0 = vcmask 523264  }
 0x3b0   :  { %v1581_v32 = vpop.f32.mrb[6].mxu0 }
 0x3b1   :  { %v1453_v12 = vmul.f32 -0.5, %v1581_v32  ;;  %v1188_v33 = vpop.f32.mrb[7].mxu0  ;;  %v1228_v1 = vmul.f32 0.5, %v1581_v32 }
 0x3b2   :  { %v1452_v34 = vmul.f32 -0.5, %v1188_v33  ;;  %v1227_v28 = vmul.f32 0.5, %v1188_v33 }
 0x3b3   :  { %v1253_v36 = vmul.f32 1.442695, %v1453_v12  ;;  %v1236_v16 = vmul.f32 1.6765325, %v1228_v1 }
 0x3b4   :  { %v1251_v38 = vmul.f32 1.442695, %v1452_v34  ;;  %v1584_v40 = vpop.f32.mrb[8].mxu0  ;;  %v1235_v17 = vmul.f32 1.6765325, %v1227_v28 }
 0x3b5   :  { %1722 = vpow2.f32 %v1253_v36  ;;  %v1455_v2 = vmul.f32 -0.5, %v1584_v40  ;;  %v1198_v6 = vpop.f32.mrb[9].mxu0  ;;  %v1230_v52 = vmul.f32 0.5, %v1584_v40 }
 0x3b6   :  { %1724 = vpow2.f32 %v1251_v38  ;;  %v1454_v25 = vmul.f32 -0.5, %v1198_v6  ;;  %v1229_v39 = vmul.f32 0.5, %v1198_v6 }
 0x3b7   :  { %v1257_v41 = vmul.f32 1.442695, %v1455_v2  ;;  %v1238_v19 = vmul.f32 1.6765325, %v1230_v52 }
 0x3b8   :  { %v1255_v42 = vmul.f32 1.442695, %v1454_v25  ;;  %v1587_v43 = vpop.f32.mrb[10].mxu0  ;;  %v1237_v22 = vmul.f32 1.6765325, %v1229_v39 }
 0x3b9   :  { %1726 = vpow2.f32 %v1257_v41  ;;  %v1457_v44 = vmul.f32 -0.5, %v1587_v43  ;;  %v1208_v47 = vpop.f32.mrb[11].mxu0  ;;  %v1232_v20 = vmul.f32 0.5, %v1587_v43 }
 0x3ba   :  { %1728 = vpow2.f32 %v1255_v42  ;;  %v1456_v18 = vmul.f32 -0.5, %v1208_v47  ;;  %v1231_v37 = vmul.f32 0.5, %v1208_v47 }
 0x3bb   :  { %v1261_v48 = vmul.f32 1.442695, %v1457_v44  ;;  %v1240_v35 = vmul.f32 1.6765325, %v1232_v20  ;;  %v1299_v44 = vld [vmem:[%s2427_s5] sm:$0xf] }
 0x3bc   :  { %v1259_v51 = vmul.f32 1.442695, %v1456_v18  ;;  %v1590_v11 = vpop.f32.mrb[12].mxu0  ;;  %v1239_v60 = vmul.f32 1.6765325, %v1231_v37 }
 0x3bd   :  { %1730 = vpow2.f32 %v1261_v48  ;;  %v1459_v45 = vmul.f32 -0.5, %v1590_v11  ;;  %v1218_v53 = vpop.f32.mrb[13].mxu0  ;;  %v1234_v32 = vmul.f32 0.5, %v1590_v11 }
 0x3be   :  { %1732 = vpow2.f32 %v1259_v51  ;;  %v1458_v49 = vmul.f32 -0.5, %v1218_v53  ;;  %v1233_v36 = vmul.f32 0.5, %v1218_v53 }
 0x3bf   :  { %v1723_v50 = vpop.eup %1722  ;;  %v1265_v55 = vmul.f32 1.442695, %v1459_v45  ;;  %v1242_v2 = vmul.f32 1.6765325, %v1234_v32 }
 0x3c0   :  { %v1725_v56 = vpop.eup %1724  ;;  %v1268_v57 = vadd.f32 1.0, %v1723_v50  ;;  %v1263_v58 = vmul.f32 1.442695, %v1458_v49  ;;  %v1241_v25 = vmul.f32 1.6765325, %v1233_v36 }
 0x3c1   :  { %v1267_v62 = vadd.f32 1.0, %v1725_v56  ;;  %1734 = vpow2.f32 %v1265_v55 }
 0x3c2   :  { %1736 = vrcp.f32 %v1268_v57 }
 0x3c3   :  { %v1727_v3 = vpop.eup %1726  ;;  %1738 = vrcp.f32 %v1267_v62 }
 0x3c4   :  { %v1729_v4 = vpop.eup %1728  ;;  %v1270_v54 = vadd.f32 1.0, %v1727_v3  ;;  %1740 = vpow2.f32 %v1263_v58 }
 0x3c5   :  { %v1269_v13 = vadd.f32 1.0, %v1729_v4 }
 0x3c6   :  { %1742 = vrcp.f32 %v1270_v54 }
 0x3c7   :  { %v1731_v61 = vpop.eup %1730  ;;  %1744 = vrcp.f32 %v1269_v13 }
 0x3c8   :  { %v1733_v8 = vpop.eup %1732  ;;  %v1272_v31 = vadd.f32 1.0, %v1731_v61 }
 0x3c9   :  { %v1271_v14 = vadd.f32 1.0, %v1733_v8 }
 0x3ca   :  { %1746 = vrcp.f32 %v1272_v31 }
 0x3cb   :  { %v1735_v15 = vpop.eup %1734  ;;  %1748 = vrcp.f32 %v1271_v14 }
 0x3cc   :  { %v1737_v59 = vpop.eup %1736  ;;  %v1274_v46 = vadd.f32 1.0, %v1735_v15 }
 0x3cd   :  { %v1739_v30 = vpop.eup %1738  ;;  %v1292_v27 = vmul.f32 %v1737_v59, %v1236_v16 }
 0x3ce   :  { %v1741_v29 = vpop.eup %1740  ;;  %v1291_v0 = vmul.f32 %v1739_v30, %v1235_v17  ;;  %1750 = vrcp.f32 %v1274_v46 }
 0x3cf   :  { %v1273_v21 = vadd.f32 1.0, %v1741_v29 }
 0x3d0   :  { %v1743_v63 = vpop.eup %1742  ;;  %v1689_v5 = vpack.c.bf16 %v1292_v27, %v1291_v0 }
 0x3d1   :  { %v1745_v23 = vpop.eup %1744  ;;  %v1294_v9 = vmul.f32 %v1743_v63, %v1238_v19  ;;  %1752 = vrcp.f32 %v1273_v21 }
 0x3d2   :  { %v1293_v24 = vmul.f32 %v1745_v23, %v1237_v22  ;;  %1690 = vmatpush3.bf16.msra.mxu0 %v1689_v5 }
 0x3d3   :  { %1691 = vmatprep.subr.bf16.mxu0 %v1803_v7 }
 0x3d4   :  { %v1747_v26 = vpop.eup %1746  ;;  %v1692_v10 = vpack.c.bf16 %v1294_v9, %v1293_v24 }
 0x3d5   :  { %v1749_v12 = vpop.eup %1748  ;;  %v1296_v33 = vmul.f32 %v1747_v26, %v1240_v35 }
 0x3d6   :  { %v1295_v34 = vmul.f32 %v1749_v12, %v1239_v60  ;;  %1693 = vmatpush3.bf16.msra.mxu0 %v1692_v10 }
 0x3d7   :  { %1694 = vmatprep.subr.bf16.mxu0 %v1803_v7 }
 0x3d8   :  { %v1751_v38 = vpop.eup %1750  ;;  %v1695_v40 = vpack.c.bf16 %v1296_v33, %v1295_v34 }
 0x3d9   :  { %v1298_v6 = vmul.f32 %v1751_v38, %v1242_v2 }
 0x3da   :  { %1696 = vmatpush3.bf16.msra.mxu0 %v1695_v40 }
 0x3db   :  { %v1753_v41 = vpop.eup %1752  ;;  %1697 = vmatprep.subr.bf16.mxu0 %v1803_v7 }
 0x3dc   :  { %v1297_v42 = vmul.f32 %v1753_v41, %v1241_v25 }
 0x3de   :  { %v1698_v43 = vpack.c.bf16 %v1298_v6, %v1297_v42 }
 0x3e0   :  { %1699 = vmatpush3.bf16.msra.mxu0 %v1698_v43 }
 0x3e3   :  { %1608 = vmatmul.mubr.msk.f32.vlgmr.msra.gmra.mrb[14].mxu0 %vm1300_vm0, %v1299_v44 }
 0x3e4   :  { %1765 = shalt.err (!%p1762_p4)
}
 0x3e5   :  { %s1766_s16 = scalar_lea.hbm %s2429_s7, 64 }
 0x3e6   :  { %p1767_p5 = scmp.ne.s32.totalorder %s2429_s7, %s1766_s16  ;;  %p1770_p6 = scmp.lt.u32.totalorder %s1766_s16, %s2429_s7 }
 0x3e8   :  { %p1772_p7 = pnand %p1770_p6, %p1767_p5 }
 0x3ea   :  { %1775 = shalt.err (!%p1772_p7)
}
 0x3eb   :  { %1396 = dma.vmem_to_hbm [thread:$0]  %s1394_s13, 64, %s2429_s7, [#allocation6]  }
 0x3ec   :  { %s1809_s22 = smov [#allocation3]  }
 0x3ed   :  { %s1383_s3 = sshll.u32 %s1809_s22, 4  ;;  %s1384_s3 = int_to_ptr.vmem [resolvable:$true] %s1383_s3 }
 0x3ee   :  { %s1776_s23 = scalar_lea.vmem %s1384_s3, 64  ;;  %p1781_p9 = scmp.lt.s32.totalorder %s1384_s3, %s1384_s3 }
 0x3ef   :  { %p1777_p8 = scmp.ne.s32.totalorder %s1384_s3, %s1776_s23  ;;  %p1782_p10 = scmp.lt.s32.totalorder %s1776_s23, %s1776_s23 }
 0x3f1   :  { %p1783_p11 = por %p1782_p10, %p1781_p9 }
 0x3f3   :  { %p1784_p12 = pnand %p1783_p11, %p1777_p8 }
 0x4b6   :  { %v1370_v7 = vpop.f32.mrb[14].mxu0 }
 0x4b7   :  { %v1374_v47 = vmul.f32 0.125, %v1370_v7  ;;  %v1609_v18 = vpop.f32.mrb[15].mxu0 }
 0x4b9   :  { %1375 = vst [vmem:[#allocation3] sm:$0xf] %v1374_v47 }
 0x4ba   :  { %1787 = shalt.err (!%p1784_p12)
}
 0x4bb   :  { %s1788_s26 = scalar_lea.hbm %s2428_s6, 64 }
 0x4bc   :  { %p1789_p13 = scmp.ne.s32.totalorder %s2428_s6, %s1788_s26  ;;  %p1792_p0 = scmp.lt.u32.totalorder %s1788_s26, %s2428_s6 }
 0x4be   :  { %p1794_p1 = pnand %p1792_p0, %p1789_p13 }
 0x4c0   :  { %1797 = shalt.err (!%p1794_p1)
}
 0x4c1   :  { %1386 = dma.vmem_to_hbm [thread:$0]  %s1384_s3, 64, %s2428_s6, [#allocation4]  }
 0x4c2   :  { %1798 = dma.done.wait [#allocation4], 64  }
 0x4c3   :  { %1799 = vsyncadd [#allocation4], 4294967232 }
 0x4c4   :  { %1800 = dma.done.wait [#allocation6], 64  }
 0x4c5   :  { %1801 = vsyncadd [#allocation6], 4294967232 }
 0x4c6   :  { %1403 = vsyncpa [#allocation4], 1 }
 0x4c7   :  { %1404 = vsyncpa [#allocation6], 1 }

</bundles_post_ra>
